<compile_context>
chip_gen: v6e
topology: v6e:2x2x1
jax: 0.10.0
libtpu: 0.0.40
codegen_flags: <defaults>
</compile_context>

<pallas_src>
import numpy as np
import jax
import jax.numpy as jnp
from jax.experimental import pallas as pl
from jax.experimental.pallas import tpu as pltpu

BN_EPS = 1e-5
LANE = 128


# ----------------------------------------------------------------------------
# Pallas kernel: one batch element per grid step.
#   x_ref  : (4, Hp+2, Wp+2, Cin)  bf16  pre-padded 2x2 pool-window slots
#   w1_ref : (9, Cin, Cout_p)      bf16  folded conv1+BN1 weight (per-tap)
#   b1_ref : (1, Cout_p)           f32   folded conv1+BN1 bias
#   w2_ref : (9, Cout_p, Cout_p)   bf16  folded conv2+BN2 weight (per-tap)
#   b2_ref : (1, Cout_p)           f32   folded conv2+BN2 bias
#   o_ref  : (Hp*Wp, Cout_p)       bf16  lane-dense output slab
#   p2_ref : (Hp+2, Wp+2, Cout_p)  bf16  VMEM scratch (zero-bordered conv2 in)
# ----------------------------------------------------------------------------
def down_kernel(x_ref, w1_ref, b1_ref, w2_ref, b2_ref, o_ref, p2_ref):
    hp2, wp2, cout_p = p2_ref.shape
    hp, wp = hp2 - 2, wp2 - 2
    cin = x_ref.shape[-1]

    # --- MaxPool2d(2): elementwise max over the 4 pre-padded window slots ---
    # The zero border added in the wrapper survives the max, so `pooled_pad`
    # is already the zero-padded conv1 input (no p1 scratch, no border fill).
    x = x_ref[...]                                      # (4, hp+2, wp+2, cin)
    pooled_pad = jnp.maximum(jnp.maximum(x[0], x[1]),
                             jnp.maximum(x[2], x[3]))   # (hp+2, wp+2, cin) bf16

    def conv3x3_bn_relu(tap_fn, c_in, w_ref, b_ref):
        # 3x3 conv as 9 per-tap matmuls accumulated in f32 (no 9x im2col
        # concat -> no tens-of-MB patches tensor at realistic shapes).
        acc = None
        for k in range(9):
            dy, dx = divmod(k, 3)
            tap = tap_fn(dy, dx).reshape(hp * wp, c_in)             # bf16
            part = jnp.dot(tap, w_ref[k],
                           preferred_element_type=jnp.float32)      # MXU
            acc = part if acc is None else acc + part
        # Folded BN bias + ReLU; the bias broadcast happens once per conv.
        return jnp.maximum(acc + b_ref[...], 0.0)       # (hp*wp, cout_p) f32

    # conv1 + BN1 + ReLU: taps slice the already-padded pooled value.
    h1 = conv3x3_bn_relu(lambda dy, dx: pooled_pad[dy:dy + hp, dx:dx + wp, :],
                         cin, w1_ref, b1_ref)

    # Stage conv1 output into the zero-bordered scratch (conv2's zero pad).
    # Only the 4 border strips are zeroed; the interior is overwritten anyway.
    zero_row = jnp.zeros((1, wp2, cout_p), p2_ref.dtype)
    zero_col = jnp.zeros((hp, 1, cout_p), p2_ref.dtype)
    p2_ref[0:1, :, :] = zero_row
    p2_ref[hp + 1:hp + 2, :, :] = zero_row
    p2_ref[1:hp + 1, 0:1, :] = zero_col
    p2_ref[1:hp + 1, wp + 1:wp + 2, :] = zero_col
    p2_ref[1:hp + 1, 1:wp + 1, :] = h1.reshape(hp, wp, cout_p).astype(p2_ref.dtype)

    # conv2 + BN2 + ReLU: taps load from the padded VMEM scratch.
    h2 = conv3x3_bn_relu(lambda dy, dx: p2_ref[dy:dy + hp, dx:dx + wp, :],
                         cout_p, w2_ref, b2_ref)

    # Single unmasked, full-lane store (Cout padded to a multiple of 128).
    o_ref[...] = h2.astype(o_ref.dtype)


def _nbytes(shape, itemsize):
    n = 1
    for s in shape:
        n *= int(s)
    return n * itemsize


# ----------------------------------------------------------------------------
# Wrapper: NCHW in / NCHW out, eval-mode BN folded into the convs.
# ----------------------------------------------------------------------------
def down_forward(x, w1, b1, g1, beta1, m1, v1, w2, b2, g2, beta2, m2, v2,
                 eps=BN_EPS):
    """x: (B, Cin, H, W) f32.  Returns (B, Cout, H//2, W//2) f32."""
    B, Cin, H, W = x.shape
    Cout = w1.shape[0]
    assert H % 2 == 0 and W % 2 == 0, "MaxPool2d(2) path assumes even H, W"
    Hp, Wp = H // 2, W // 2
    # Pad the output-channel (matmul N / lane) dim to a multiple of 128 so the
    # output store is unmasked and the MXU N dim is full.  Padded channels are
    # exact zeros end-to-end (zero weights + zero bias -> ReLU(0) = 0).
    Cout_p = ((Cout + LANE - 1) // LANE) * LANE

    # ---- fold eval-mode BatchNorm into the convs ---------------------------
    s1 = g1 / jnp.sqrt(v1 + eps)
    w1f = w1 * s1[:, None, None, None]                  # (Cout, Cin, 3, 3)
    b1f = s1 * (b1 - m1) + beta1                        # (Cout,)
    s2 = g2 / jnp.sqrt(v2 + eps)
    w2f = w2 * s2[:, None, None, None]                  # (Cout, Cout, 3, 3)
    b2f = s2 * (b2 - m2) + beta2                        # (Cout,)

    # ---- per-tap weight layout: (9, C_in, C_out), tap k = dy*3 + dx --------
    w1_t = jnp.transpose(w1f, (2, 3, 1, 0)).reshape(9, Cin, Cout)
    w2_t = jnp.transpose(w2f, (2, 3, 1, 0)).reshape(9, Cout, Cout)
    w1_t = jnp.pad(w1_t, ((0, 0), (0, 0), (0, Cout_p - Cout))).astype(jnp.bfloat16)
    w2_t = jnp.pad(w2_t, ((0, 0), (0, Cout_p - Cout),
                          (0, Cout_p - Cout))).astype(jnp.bfloat16)
    b1_row = jnp.pad(b1f, (0, Cout_p - Cout)).reshape(1, Cout_p).astype(jnp.float32)
    b2_row = jnp.pad(b2f, (0, Cout_p - Cout)).reshape(1, Cout_p).astype(jnp.float32)

    # ---- layout plumbing: channels-last, pre-split + pre-padded pool slots --
    x_nhwc = jnp.transpose(x, (0, 2, 3, 1))             # (B, H, W, Cin)
    x_win = x_nhwc.reshape(B, Hp, 2, Wp, 2, Cin)
    x_win = jnp.transpose(x_win, (0, 2, 4, 1, 3, 5))    # (B, 2, 2, Hp, Wp, Cin)
    x_win = x_win.reshape(B, 4, Hp, Wp, Cin)
    # Spatial zero pad here == conv1's zero padding after the in-kernel max.
    x_win = jnp.pad(x_win, ((0, 0), (0, 0), (1, 1), (1, 1), (0, 0)))
    x_win = x_win.astype(jnp.bfloat16)                  # (B, 4, Hp+2, Wp+2, Cin)

    out_block = (Hp * Wp, Cout_p)

    # ---- explicit VMEM budget (double-buffered I/O blocks + resident rest) --
    est = (
        2 * _nbytes((4, Hp + 2, Wp + 2, Cin), 2)        # x block, 2 buffers
        + 2 * _nbytes(out_block, 2)                     # out block, 2 buffers
        + _nbytes((9, Cin, Cout_p), 2)                  # w1 (single copy)
        + _nbytes((9, Cout_p, Cout_p), 2)               # w2 (single copy)
        + 2 * _nbytes((1, Cout_p), 4)                   # biases
        + _nbytes((Hp + 2, Wp + 2, Cout_p), 2)          # p2 scratch
        # rough in-kernel transients: pooled input, one tap, f32 activations
        + _nbytes((Hp + 2, Wp + 2, Cin), 2)
        + _nbytes((Hp * Wp, Cout_p), 2)
        + 2 * _nbytes((Hp * Wp, Cout_p), 4)
    )
    vmem_limit = int(min(64 * 1024 * 1024, max(4 * 1024 * 1024, 2 * est)))

    out = pl.pallas_call(
        down_kernel,
        out_shape=jax.ShapeDtypeStruct((B,) + out_block, jnp.bfloat16),
        grid_spec=pltpu.PrefetchScalarGridSpec(
            num_scalar_prefetch=0,
            grid=(B,),
            in_specs=[
                pl.BlockSpec((None, 4, Hp + 2, Wp + 2, Cin),
                             lambda b: (b, 0, 0, 0, 0)),
                # Whole-operand VMEM residency: one copy, no double-buffering.
                pl.BlockSpec(memory_space=pltpu.MemorySpace.VMEM),  # w1
                pl.BlockSpec(memory_space=pltpu.MemorySpace.VMEM),  # b1
                pl.BlockSpec(memory_space=pltpu.MemorySpace.VMEM),  # w2
                pl.BlockSpec(memory_space=pltpu.MemorySpace.VMEM),  # b2
            ],
            out_specs=pl.BlockSpec((None,) + out_block, lambda b: (b, 0, 0)),
            scratch_shapes=[
                pltpu.VMEM((Hp + 2, Wp + 2, Cout_p), jnp.bfloat16),
            ],
        ),
        compiler_params=pltpu.CompilerParams(
            dimension_semantics=("parallel",),
            vmem_limit_bytes=vmem_limit),
    )(x_win, w1_t, b1_row, w2_t, b2_row)

    out = out.reshape(B, Hp, Wp, Cout_p)[..., :Cout]     # drop channel padding
    return jnp.transpose(out, (0, 3, 1, 2)).astype(jnp.float32)  # back to NCHW


# ----------------------------------------------------------------------------
# Pure-JAX f32 reference (true module semantics) for validation.
# ----------------------------------------------------------------------------
def down_ref(x, w1, b1, g1, beta1, m1, v1, w2, b2, g2, beta2, m2, v2,
             eps=BN_EPS):
    B, C, H, W = x.shape
    xp = x.reshape(B, C, H // 2, 2, W // 2, 2).max(axis=(3, 5))   # MaxPool2d(2)

    def block(y, w, b, g, be, m, v):
        y = jax.lax.conv_general_dilated(
            y, w, window_strides=(1, 1), padding=((1, 1), (1, 1)),
            dimension_numbers=("NCHW", "OIHW", "NCHW"))
        y = y + b[None, :, None, None]
        s = g / jnp.sqrt(v + eps)
        y = s[None, :, None, None] * (y - m[None, :, None, None]) \
            + be[None, :, None, None]
        return jnp.maximum(y, 0.0)

    y = block(xp, w1, b1, g1, beta1, m1, v1)
    y = block(y, w2, b2, g2, beta2, m2, v2)
    return y


if __name__ == "__main__":
    B, Cin, Cout, H, W = 2, 4, 8, 16, 16
    key = jax.random.PRNGKey(0)
    ks = jax.random.split(key, 13)

    x = jax.random.normal(ks[0], (B, Cin, H, W), dtype=jnp.float32)

    # Conv2d(Cin, Cout, 3, padding=1) + BatchNorm2d(Cout)
    w1 = 0.3 * jax.random.normal(ks[1], (Cout, Cin, 3, 3), dtype=jnp.float32)
    b1 = 0.1 * jax.random.normal(ks[2], (Cout,), dtype=jnp.float32)
    g1 = 1.0 + 0.1 * jax.random.normal(ks[3], (Cout,), dtype=jnp.float32)
    be1 = 0.1 * jax.random.normal(ks[4], (Cout,), dtype=jnp.float32)
    m1 = 0.1 * jax.random.normal(ks[5], (Cout,), dtype=jnp.float32)
    v1 = 1.0 + 0.1 * jax.nn.softplus(jax.random.normal(ks[6], (Cout,), dtype=jnp.float32))

    # Conv2d(Cout, Cout, 3, padding=1) + BatchNorm2d(Cout)
    w2 = 0.2 * jax.random.normal(ks[7], (Cout, Cout, 3, 3), dtype=jnp.float32)
    b2 = 0.1 * jax.random.normal(ks[8], (Cout,), dtype=jnp.float32)
    g2 = 1.0 + 0.1 * jax.random.normal(ks[9], (Cout,), dtype=jnp.float32)
    be2 = 0.1 * jax.random.normal(ks[10], (Cout,), dtype=jnp.float32)
    m2 = 0.1 * jax.random.normal(ks[11], (Cout,), dtype=jnp.float32)
    v2 = 1.0 + 0.1 * jax.nn.softplus(jax.random.normal(ks[12], (Cout,), dtype=jnp.float32))

    out = down_forward(x, w1, b1, g1, be1, m1, v1, w2, b2, g2, be2, m2, v2)
    out = jax.block_until_ready(out)

    ref = down_ref(x, w1, b1, g1, be1, m1, v1, w2, b2, g2, be2, m2, v2)
    assert out.shape == (B, Cout, H // 2, W // 2), out.shape
    # bf16 MXU operands / bf16 intermediates & output vs an f32 reference
    # -> loose tolerance (documented inference-grade numerics).
    np.testing.assert_allclose(np.asarray(out), np.asarray(ref),
                               rtol=1e-1, atol=2e-1)

    print("KERNEL_OK")
</pallas_src>

<mosaic_0001>
module attributes {stable_mosaic.version = 11 : i64} {
  func.func @down_kernel(%arg0: i32, %arg1: memref<1x4x10x10x4xbf16, #tpu.memory_space<vmem>>, %arg2: memref<9x4x128xbf16, #tpu.memory_space<vmem>>, %arg3: memref<1x128xf32, #tpu.memory_space<vmem>>, %arg4: memref<9x128x128xbf16, #tpu.memory_space<vmem>>, %arg5: memref<1x128xf32, #tpu.memory_space<vmem>>, %arg6: memref<1x64x128xbf16, #tpu.memory_space<vmem>>, %arg7: memref<10x10x128xbf16, #tpu.memory_space<vmem>>) attributes {dimension_semantics = [#tpu.dimension_semantics<parallel>], iteration_bounds = array<i64: 2>, scalar_prefetch = 0 : i64, scratch_operands = 1 : i64, tpu.core_type = #tpu.core_type<tc>, window_params = [{transform_indices = @transform_0, window_bounds = array<i64: 1, 4, 10, 10, 4>}, {pipeline_mode = #tpu.pipeline_mode<synchronous>, transform_indices = @transform_1, window_bounds = array<i64: 9, 4, 128>}, {pipeline_mode = #tpu.pipeline_mode<synchronous>, transform_indices = @transform_2, window_bounds = array<i64: 1, 128>}, {pipeline_mode = #tpu.pipeline_mode<synchronous>, transform_indices = @transform_3, window_bounds = array<i64: 9, 128, 128>}, {pipeline_mode = #tpu.pipeline_mode<synchronous>, transform_indices = @transform_4, window_bounds = array<i64: 1, 128>}, {transform_indices = @transform_5, window_bounds = array<i64: 1, 64, 128>}]} {
    %c0 = arith.constant 0 : index
    %c0_0 = arith.constant 0 : index
    %c0_1 = arith.constant 0 : index
    %c0_2 = arith.constant 0 : index
    %c0_3 = arith.constant 0 : index
    %0 = vector.load %arg1[%c0, %c0_0, %c0_1, %c0_2, %c0_3] : memref<1x4x10x10x4xbf16, #tpu.memory_space<vmem>>, vector<1x4x10x10x4xbf16>
    %1 = vector.shape_cast %0 : vector<1x4x10x10x4xbf16> to vector<4x10x10x4xbf16>
    %2 = vector.extract_strided_slice %1 {offsets = [0, 0, 0, 0], sizes = [1, 10, 10, 4], strides = [1, 1, 1, 1]} : vector<4x10x10x4xbf16> to vector<1x10x10x4xbf16>
    %3 = vector.shape_cast %2 : vector<1x10x10x4xbf16> to vector<10x10x4xbf16>
    %4 = vector.extract_strided_slice %1 {offsets = [1, 0, 0, 0], sizes = [1, 10, 10, 4], strides = [1, 1, 1, 1]} : vector<4x10x10x4xbf16> to vector<1x10x10x4xbf16>
    %5 = vector.shape_cast %4 : vector<1x10x10x4xbf16> to vector<10x10x4xbf16>
    %6 = arith.maximumf %3, %5 : vector<10x10x4xbf16>
    %7 = vector.extract_strided_slice %1 {offsets = [2, 0, 0, 0], sizes = [1, 10, 10, 4], strides = [1, 1, 1, 1]} : vector<4x10x10x4xbf16> to vector<1x10x10x4xbf16>
    %8 = vector.shape_cast %7 : vector<1x10x10x4xbf16> to vector<10x10x4xbf16>
    %9 = vector.extract_strided_slice %1 {offsets = [3, 0, 0, 0], sizes = [1, 10, 10, 4], strides = [1, 1, 1, 1]} : vector<4x10x10x4xbf16> to vector<1x10x10x4xbf16>
    %10 = vector.shape_cast %9 : vector<1x10x10x4xbf16> to vector<10x10x4xbf16>
    %11 = arith.maximumf %8, %10 : vector<10x10x4xbf16>
    %12 = arith.maximumf %6, %11 : vector<10x10x4xbf16>
    %13 = vector.extract_strided_slice %12 {offsets = [0, 0, 0], sizes = [8, 8, 4], strides = [1, 1, 1]} : vector<10x10x4xbf16> to vector<8x8x4xbf16>
    %14 = vector.shape_cast %13 : vector<8x8x4xbf16> to vector<64x4xbf16>
    %c0_4 = arith.constant 0 : index
    %c0_5 = arith.constant 0 : index
    %c0_6 = arith.constant 0 : index
    %15 = vector.load %arg2[%c0_4, %c0_5, %c0_6] : memref<9x4x128xbf16, #tpu.memory_space<vmem>>, vector<1x4x128xbf16>
    %16 = vector.shape_cast %15 : vector<1x4x128xbf16> to vector<4x128xbf16>
    %cst = arith.constant dense<0.000000e+00> : vector<64x128xf32>
    %17 = tpu.matmul %14, %16, %cst {dimension_numbers = #tpu.dot_dimension_numbers<[1], [0], [0], [1], [0, 0, 1, 1], [], []>} : vector<64x4xbf16>, vector<4x128xbf16>, vector<64x128xf32> -> vector<64x128xf32>
    %18 = vector.extract_strided_slice %12 {offsets = [0, 1, 0], sizes = [8, 8, 4], strides = [1, 1, 1]} : vector<10x10x4xbf16> to vector<8x8x4xbf16>
    %19 = vector.shape_cast %18 : vector<8x8x4xbf16> to vector<64x4xbf16>
    %c1 = arith.constant 1 : index
    %c0_7 = arith.constant 0 : index
    %c0_8 = arith.constant 0 : index
    %20 = vector.load %arg2[%c1, %c0_7, %c0_8] : memref<9x4x128xbf16, #tpu.memory_space<vmem>>, vector<1x4x128xbf16>
    %21 = vector.shape_cast %20 : vector<1x4x128xbf16> to vector<4x128xbf16>
    %cst_9 = arith.constant dense<0.000000e+00> : vector<64x128xf32>
    %22 = tpu.matmul %19, %21, %cst_9 {dimension_numbers = #tpu.dot_dimension_numbers<[1], [0], [0], [1], [0, 0, 1, 1], [], []>} : vector<64x4xbf16>, vector<4x128xbf16>, vector<64x128xf32> -> vector<64x128xf32>
    %23 = arith.addf %17, %22 : vector<64x128xf32>
    %24 = vector.extract_strided_slice %12 {offsets = [0, 2, 0], sizes = [8, 8, 4], strides = [1, 1, 1]} : vector<10x10x4xbf16> to vector<8x8x4xbf16>
    %25 = vector.shape_cast %24 : vector<8x8x4xbf16> to vector<64x4xbf16>
    %c2 = arith.constant 2 : index
    %c0_10 = arith.constant 0 : index
    %c0_11 = arith.constant 0 : index
    %26 = vector.load %arg2[%c2, %c0_10, %c0_11] : memref<9x4x128xbf16, #tpu.memory_space<vmem>>, vector<1x4x128xbf16>
    %27 = vector.shape_cast %26 : vector<1x4x128xbf16> to vector<4x128xbf16>
    %cst_12 = arith.constant dense<0.000000e+00> : vector<64x128xf32>
    %28 = tpu.matmul %25, %27, %cst_12 {dimension_numbers = #tpu.dot_dimension_numbers<[1], [0], [0], [1], [0, 0, 1, 1], [], []>} : vector<64x4xbf16>, vector<4x128xbf16>, vector<64x128xf32> -> vector<64x128xf32>
    %29 = arith.addf %23, %28 : vector<64x128xf32>
    %30 = vector.extract_strided_slice %12 {offsets = [1, 0, 0], sizes = [8, 8, 4], strides = [1, 1, 1]} : vector<10x10x4xbf16> to vector<8x8x4xbf16>
    %31 = vector.shape_cast %30 : vector<8x8x4xbf16> to vector<64x4xbf16>
    %c3 = arith.constant 3 : index
    %c0_13 = arith.constant 0 : index
    %c0_14 = arith.constant 0 : index
    %32 = vector.load %arg2[%c3, %c0_13, %c0_14] : memref<9x4x128xbf16, #tpu.memory_space<vmem>>, vector<1x4x128xbf16>
    %33 = vector.shape_cast %32 : vector<1x4x128xbf16> to vector<4x128xbf16>
    %cst_15 = arith.constant dense<0.000000e+00> : vector<64x128xf32>
    %34 = tpu.matmul %31, %33, %cst_15 {dimension_numbers = #tpu.dot_dimension_numbers<[1], [0], [0], [1], [0, 0, 1, 1], [], []>} : vector<64x4xbf16>, vector<4x128xbf16>, vector<64x128xf32> -> vector<64x128xf32>
    %35 = arith.addf %29, %34 : vector<64x128xf32>
    %36 = vector.extract_strided_slice %12 {offsets = [1, 1, 0], sizes = [8, 8, 4], strides = [1, 1, 1]} : vector<10x10x4xbf16> to vector<8x8x4xbf16>
    %37 = vector.shape_cast %36 : vector<8x8x4xbf16> to vector<64x4xbf16>
    %c4 = arith.constant 4 : index
    %c0_16 = arith.constant 0 : index
    %c0_17 = arith.constant 0 : index
    %38 = vector.load %arg2[%c4, %c0_16, %c0_17] : memref<9x4x128xbf16, #tpu.memory_space<vmem>>, vector<1x4x128xbf16>
    %39 = vector.shape_cast %38 : vector<1x4x128xbf16> to vector<4x128xbf16>
    %cst_18 = arith.constant dense<0.000000e+00> : vector<64x128xf32>
    %40 = tpu.matmul %37, %39, %cst_18 {dimension_numbers = #tpu.dot_dimension_numbers<[1], [0], [0], [1], [0, 0, 1, 1], [], []>} : vector<64x4xbf16>, vector<4x128xbf16>, vector<64x128xf32> -> vector<64x128xf32>
    %41 = arith.addf %35, %40 : vector<64x128xf32>
    %42 = vector.extract_strided_slice %12 {offsets = [1, 2, 0], sizes = [8, 8, 4], strides = [1, 1, 1]} : vector<10x10x4xbf16> to vector<8x8x4xbf16>
    %43 = vector.shape_cast %42 : vector<8x8x4xbf16> to vector<64x4xbf16>
    %c5 = arith.constant 5 : index
    %c0_19 = arith.constant 0 : index
    %c0_20 = arith.constant 0 : index
    %44 = vector.load %arg2[%c5, %c0_19, %c0_20] : memref<9x4x128xbf16, #tpu.memory_space<vmem>>, vector<1x4x128xbf16>
    %45 = vector.shape_cast %44 : vector<1x4x128xbf16> to vector<4x128xbf16>
    %cst_21 = arith.constant dense<0.000000e+00> : vector<64x128xf32>
    %46 = tpu.matmul %43, %45, %cst_21 {dimension_numbers = #tpu.dot_dimension_numbers<[1], [0], [0], [1], [0, 0, 1, 1], [], []>} : vector<64x4xbf16>, vector<4x128xbf16>, vector<64x128xf32> -> vector<64x128xf32>
    %47 = arith.addf %41, %46 : vector<64x128xf32>
    %48 = vector.extract_strided_slice %12 {offsets = [2, 0, 0], sizes = [8, 8, 4], strides = [1, 1, 1]} : vector<10x10x4xbf16> to vector<8x8x4xbf16>
    %49 = vector.shape_cast %48 : vector<8x8x4xbf16> to vector<64x4xbf16>
    %c6 = arith.constant 6 : index
    %c0_22 = arith.constant 0 : index
    %c0_23 = arith.constant 0 : index
    %50 = vector.load %arg2[%c6, %c0_22, %c0_23] : memref<9x4x128xbf16, #tpu.memory_space<vmem>>, vector<1x4x128xbf16>
    %51 = vector.shape_cast %50 : vector<1x4x128xbf16> to vector<4x128xbf16>
    %cst_24 = arith.constant dense<0.000000e+00> : vector<64x128xf32>
    %52 = tpu.matmul %49, %51, %cst_24 {dimension_numbers = #tpu.dot_dimension_numbers<[1], [0], [0], [1], [0, 0, 1, 1], [], []>} : vector<64x4xbf16>, vector<4x128xbf16>, vector<64x128xf32> -> vector<64x128xf32>
    %53 = arith.addf %47, %52 : vector<64x128xf32>
    %54 = vector.extract_strided_slice %12 {offsets = [2, 1, 0], sizes = [8, 8, 4], strides = [1, 1, 1]} : vector<10x10x4xbf16> to vector<8x8x4xbf16>
    %55 = vector.shape_cast %54 : vector<8x8x4xbf16> to vector<64x4xbf16>
    %c7 = arith.constant 7 : index
    %c0_25 = arith.constant 0 : index
    %c0_26 = arith.constant 0 : index
    %56 = vector.load %arg2[%c7, %c0_25, %c0_26] : memref<9x4x128xbf16, #tpu.memory_space<vmem>>, vector<1x4x128xbf16>
    %57 = vector.shape_cast %56 : vector<1x4x128xbf16> to vector<4x128xbf16>
    %cst_27 = arith.constant dense<0.000000e+00> : vector<64x128xf32>
    %58 = tpu.matmul %55, %57, %cst_27 {dimension_numbers = #tpu.dot_dimension_numbers<[1], [0], [0], [1], [0, 0, 1, 1], [], []>} : vector<64x4xbf16>, vector<4x128xbf16>, vector<64x128xf32> -> vector<64x128xf32>
    %59 = arith.addf %53, %58 : vector<64x128xf32>
    %60 = vector.extract_strided_slice %12 {offsets = [2, 2, 0], sizes = [8, 8, 4], strides = [1, 1, 1]} : vector<10x10x4xbf16> to vector<8x8x4xbf16>
    %61 = vector.shape_cast %60 : vector<8x8x4xbf16> to vector<64x4xbf16>
    %c8 = arith.constant 8 : index
    %c0_28 = arith.constant 0 : index
    %c0_29 = arith.constant 0 : index
    %62 = vector.load %arg2[%c8, %c0_28, %c0_29] : memref<9x4x128xbf16, #tpu.memory_space<vmem>>, vector<1x4x128xbf16>
    %63 = vector.shape_cast %62 : vector<1x4x128xbf16> to vector<4x128xbf16>
    %cst_30 = arith.constant dense<0.000000e+00> : vector<64x128xf32>
    %64 = tpu.matmul %61, %63, %cst_30 {dimension_numbers = #tpu.dot_dimension_numbers<[1], [0], [0], [1], [0, 0, 1, 1], [], []>} : vector<64x4xbf16>, vector<4x128xbf16>, vector<64x128xf32> -> vector<64x128xf32>
    %65 = arith.addf %59, %64 : vector<64x128xf32>
    %c0_31 = arith.constant 0 : index
    %c0_32 = arith.constant 0 : index
    %66 = vector.load %arg3[%c0_31, %c0_32] : memref<1x128xf32, #tpu.memory_space<vmem>>, vector<1x128xf32>
    %67 = vector.broadcast %66 : vector<1x128xf32> to vector<64x128xf32>
    %68 = arith.addf %65, %67 : vector<64x128xf32>
    %cst_33 = arith.constant 0.000000e+00 : f32
    %69 = vector.broadcast %cst_33 : f32 to vector<64x128xf32>
    %70 = arith.maximumf %68, %69 : vector<64x128xf32>
    %cst_34 = arith.constant 0.000000e+00 : bf16
    %71 = vector.broadcast %cst_34 : bf16 to vector<1x10x128xbf16>
    %cst_35 = arith.constant 0.000000e+00 : bf16
    %72 = vector.broadcast %cst_35 : bf16 to vector<8x1x128xbf16>
    %c0_36 = arith.constant 0 : index
    %c0_37 = arith.constant 0 : index
    %c0_38 = arith.constant 0 : index
    %73 = vector.load %arg7[%c0_36, %c0_37, %c0_38] : memref<10x10x128xbf16, #tpu.memory_space<vmem>>, vector<1x10x128xbf16>
    tpu.vector_store %arg7[%c0_36, %c0_37, %c0_38], %71 {strides = array<i32>} : memref<10x10x128xbf16, #tpu.memory_space<vmem>>, vector<1x10x128xbf16>,
    %c9 = arith.constant 9 : index
    %c0_39 = arith.constant 0 : index
    %c0_40 = arith.constant 0 : index
    %74 = vector.load %arg7[%c9, %c0_39, %c0_40] : memref<10x10x128xbf16, #tpu.memory_space<vmem>>, vector<1x10x128xbf16>
    tpu.vector_store %arg7[%c9, %c0_39, %c0_40], %71 {strides = array<i32>} : memref<10x10x128xbf16, #tpu.memory_space<vmem>>, vector<1x10x128xbf16>,
    %c1_41 = arith.constant 1 : index
    %c0_42 = arith.constant 0 : index
    %c0_43 = arith.constant 0 : index
    %75 = vector.load %arg7[%c1_41, %c0_42, %c0_43] : memref<10x10x128xbf16, #tpu.memory_space<vmem>>, vector<8x1x128xbf16>
    tpu.vector_store %arg7[%c1_41, %c0_42, %c0_43], %72 {strides = array<i32>} : memref<10x10x128xbf16, #tpu.memory_space<vmem>>, vector<8x1x128xbf16>,
    %c1_44 = arith.constant 1 : index
    %c9_45 = arith.constant 9 : index
    %c0_46 = arith.constant 0 : index
    %76 = vector.load %arg7[%c1_44, %c9_45, %c0_46] : memref<10x10x128xbf16, #tpu.memory_space<vmem>>, vector<8x1x128xbf16>
    tpu.vector_store %arg7[%c1_44, %c9_45, %c0_46], %72 {strides = array<i32>} : memref<10x10x128xbf16, #tpu.memory_space<vmem>>, vector<8x1x128xbf16>,
    %77 = vector.shape_cast %70 : vector<64x128xf32> to vector<8x8x128xf32>
    %78 = arith.truncf %77 : vector<8x8x128xf32> to vector<8x8x128xbf16>
    %c1_47 = arith.constant 1 : index
    %c1_48 = arith.constant 1 : index
    %c0_49 = arith.constant 0 : index
    %79 = vector.load %arg7[%c1_47, %c1_48, %c0_49] : memref<10x10x128xbf16, #tpu.memory_space<vmem>>, vector<8x8x128xbf16>
    tpu.vector_store %arg7[%c1_47, %c1_48, %c0_49], %78 {strides = array<i32>} : memref<10x10x128xbf16, #tpu.memory_space<vmem>>, vector<8x8x128xbf16>,
    %c0_50 = arith.constant 0 : index
    %c0_51 = arith.constant 0 : index
    %c0_52 = arith.constant 0 : index
    %80 = vector.load %arg7[%c0_50, %c0_51, %c0_52] : memref<10x10x128xbf16, #tpu.memory_space<vmem>>, vector<8x8x128xbf16>
    %81 = vector.shape_cast %80 : vector<8x8x128xbf16> to vector<64x128xbf16>
    %c0_53 = arith.constant 0 : index
    %c0_54 = arith.constant 0 : index
    %c0_55 = arith.constant 0 : index
    %82 = vector.load %arg4[%c0_53, %c0_54, %c0_55] : memref<9x128x128xbf16, #tpu.memory_space<vmem>>, vector<1x128x128xbf16>
    %83 = vector.shape_cast %82 : vector<1x128x128xbf16> to vector<128x128xbf16>
    %cst_56 = arith.constant dense<0.000000e+00> : vector<64x128xf32>
    %84 = tpu.matmul %81, %83, %cst_56 {dimension_numbers = #tpu.dot_dimension_numbers<[1], [0], [0], [1], [0, 0, 1, 1], [], []>} : vector<64x128xbf16>, vector<128x128xbf16>, vector<64x128xf32> -> vector<64x128xf32>
    %c0_57 = arith.constant 0 : index
    %c1_58 = arith.constant 1 : index
    %c0_59 = arith.constant 0 : index
    %85 = vector.load %arg7[%c0_57, %c1_58, %c0_59] : memref<10x10x128xbf16, #tpu.memory_space<vmem>>, vector<8x8x128xbf16>
    %86 = vector.shape_cast %85 : vector<8x8x128xbf16> to vector<64x128xbf16>
    %c1_60 = arith.constant 1 : index
    %c0_61 = arith.constant 0 : index
    %c0_62 = arith.constant 0 : index
    %87 = vector.load %arg4[%c1_60, %c0_61, %c0_62] : memref<9x128x128xbf16, #tpu.memory_space<vmem>>, vector<1x128x128xbf16>
    %88 = vector.shape_cast %87 : vector<1x128x128xbf16> to vector<128x128xbf16>
    %cst_63 = arith.constant dense<0.000000e+00> : vector<64x128xf32>
    %89 = tpu.matmul %86, %88, %cst_63 {dimension_numbers = #tpu.dot_dimension_numbers<[1], [0], [0], [1], [0, 0, 1, 1], [], []>} : vector<64x128xbf16>, vector<128x128xbf16>, vector<64x128xf32> -> vector<64x128xf32>
    %90 = arith.addf %84, %89 : vector<64x128xf32>
    %c0_64 = arith.constant 0 : index
    %c2_65 = arith.constant 2 : index
    %c0_66 = arith.constant 0 : index
    %91 = vector.load %arg7[%c0_64, %c2_65, %c0_66] : memref<10x10x128xbf16, #tpu.memory_space<vmem>>, vector<8x8x128xbf16>
    %92 = vector.shape_cast %91 : vector<8x8x128xbf16> to vector<64x128xbf16>
    %c2_67 = arith.constant 2 : index
    %c0_68 = arith.constant 0 : index
    %c0_69 = arith.constant 0 : index
    %93 = vector.load %arg4[%c2_67, %c0_68, %c0_69] : memref<9x128x128xbf16, #tpu.memory_space<vmem>>, vector<1x128x128xbf16>
    %94 = vector.shape_cast %93 : vector<1x128x128xbf16> to vector<128x128xbf16>
    %cst_70 = arith.constant dense<0.000000e+00> : vector<64x128xf32>
    %95 = tpu.matmul %92, %94, %cst_70 {dimension_numbers = #tpu.dot_dimension_numbers<[1], [0], [0], [1], [0, 0, 1, 1], [], []>} : vector<64x128xbf16>, vector<128x128xbf16>, vector<64x128xf32> -> vector<64x128xf32>
    %96 = arith.addf %90, %95 : vector<64x128xf32>
    %c1_71 = arith.constant 1 : index
    %c0_72 = arith.constant 0 : index
    %c0_73 = arith.constant 0 : index
    %97 = vector.load %arg7[%c1_71, %c0_72, %c0_73] : memref<10x10x128xbf16, #tpu.memory_space<vmem>>, vector<8x8x128xbf16>
    %98 = vector.shape_cast %97 : vector<8x8x128xbf16> to vector<64x128xbf16>
    %c3_74 = arith.constant 3 : index
    %c0_75 = arith.constant 0 : index
    %c0_76 = arith.constant 0 : index
    %99 = vector.load %arg4[%c3_74, %c0_75, %c0_76] : memref<9x128x128xbf16, #tpu.memory_space<vmem>>, vector<1x128x128xbf16>
    %100 = vector.shape_cast %99 : vector<1x128x128xbf16> to vector<128x128xbf16>
    %cst_77 = arith.constant dense<0.000000e+00> : vector<64x128xf32>
    %101 = tpu.matmul %98, %100, %cst_77 {dimension_numbers = #tpu.dot_dimension_numbers<[1], [0], [0], [1], [0, 0, 1, 1], [], []>} : vector<64x128xbf16>, vector<128x128xbf16>, vector<64x128xf32> -> vector<64x128xf32>
    %102 = arith.addf %96, %101 : vector<64x128xf32>
    %c1_78 = arith.constant 1 : index
    %c1_79 = arith.constant 1 : index
    %c0_80 = arith.constant 0 : index
    %103 = vector.load %arg7[%c1_78, %c1_79, %c0_80] : memref<10x10x128xbf16, #tpu.memory_space<vmem>>, vector<8x8x128xbf16>
    %104 = vector.shape_cast %103 : vector<8x8x128xbf16> to vector<64x128xbf16>
    %c4_81 = arith.constant 4 : index
    %c0_82 = arith.constant 0 : index
    %c0_83 = arith.constant 0 : index
    %105 = vector.load %arg4[%c4_81, %c0_82, %c0_83] : memref<9x128x128xbf16, #tpu.memory_space<vmem>>, vector<1x128x128xbf16>
    %106 = vector.shape_cast %105 : vector<1x128x128xbf16> to vector<128x128xbf16>
    %cst_84 = arith.constant dense<0.000000e+00> : vector<64x128xf32>
    %107 = tpu.matmul %104, %106, %cst_84 {dimension_numbers = #tpu.dot_dimension_numbers<[1], [0], [0], [1], [0, 0, 1, 1], [], []>} : vector<64x128xbf16>, vector<128x128xbf16>, vector<64x128xf32> -> vector<64x128xf32>
    %108 = arith.addf %102, %107 : vector<64x128xf32>
    %c1_85 = arith.constant 1 : index
    %c2_86 = arith.constant 2 : index
    %c0_87 = arith.constant 0 : index
    %109 = vector.load %arg7[%c1_85, %c2_86, %c0_87] : memref<10x10x128xbf16, #tpu.memory_space<vmem>>, vector<8x8x128xbf16>
    %110 = vector.shape_cast %109 : vector<8x8x128xbf16> to vector<64x128xbf16>
    %c5_88 = arith.constant 5 : index
    %c0_89 = arith.constant 0 : index
    %c0_90 = arith.constant 0 : index
    %111 = vector.load %arg4[%c5_88, %c0_89, %c0_90] : memref<9x128x128xbf16, #tpu.memory_space<vmem>>, vector<1x128x128xbf16>
    %112 = vector.shape_cast %111 : vector<1x128x128xbf16> to vector<128x128xbf16>
    %cst_91 = arith.constant dense<0.000000e+00> : vector<64x128xf32>
    %113 = tpu.matmul %110, %112, %cst_91 {dimension_numbers = #tpu.dot_dimension_numbers<[1], [0], [0], [1], [0, 0, 1, 1], [], []>} : vector<64x128xbf16>, vector<128x128xbf16>, vector<64x128xf32> -> vector<64x128xf32>
    %114 = arith.addf %108, %113 : vector<64x128xf32>
    %c2_92 = arith.constant 2 : index
    %c0_93 = arith.constant 0 : index
    %c0_94 = arith.constant 0 : index
    %115 = vector.load %arg7[%c2_92, %c0_93, %c0_94] : memref<10x10x128xbf16, #tpu.memory_space<vmem>>, vector<8x8x128xbf16>
    %116 = vector.shape_cast %115 : vector<8x8x128xbf16> to vector<64x128xbf16>
    %c6_95 = arith.constant 6 : index
    %c0_96 = arith.constant 0 : index
    %c0_97 = arith.constant 0 : index
    %117 = vector.load %arg4[%c6_95, %c0_96, %c0_97] : memref<9x128x128xbf16, #tpu.memory_space<vmem>>, vector<1x128x128xbf16>
    %118 = vector.shape_cast %117 : vector<1x128x128xbf16> to vector<128x128xbf16>
    %cst_98 = arith.constant dense<0.000000e+00> : vector<64x128xf32>
    %119 = tpu.matmul %116, %118, %cst_98 {dimension_numbers = #tpu.dot_dimension_numbers<[1], [0], [0], [1], [0, 0, 1, 1], [], []>} : vector<64x128xbf16>, vector<128x128xbf16>, vector<64x128xf32> -> vector<64x128xf32>
    %120 = arith.addf %114, %119 : vector<64x128xf32>
    %c2_99 = arith.constant 2 : index
    %c1_100 = arith.constant 1 : index
    %c0_101 = arith.constant 0 : index
    %121 = vector.load %arg7[%c2_99, %c1_100, %c0_101] : memref<10x10x128xbf16, #tpu.memory_space<vmem>>, vector<8x8x128xbf16>
    %122 = vector.shape_cast %121 : vector<8x8x128xbf16> to vector<64x128xbf16>
    %c7_102 = arith.constant 7 : index
    %c0_103 = arith.constant 0 : index
    %c0_104 = arith.constant 0 : index
    %123 = vector.load %arg4[%c7_102, %c0_103, %c0_104] : memref<9x128x128xbf16, #tpu.memory_space<vmem>>, vector<1x128x128xbf16>
    %124 = vector.shape_cast %123 : vector<1x128x128xbf16> to vector<128x128xbf16>
    %cst_105 = arith.constant dense<0.000000e+00> : vector<64x128xf32>
    %125 = tpu.matmul %122, %124, %cst_105 {dimension_numbers = #tpu.dot_dimension_numbers<[1], [0], [0], [1], [0, 0, 1, 1], [], []>} : vector<64x128xbf16>, vector<128x128xbf16>, vector<64x128xf32> -> vector<64x128xf32>
    %126 = arith.addf %120, %125 : vector<64x128xf32>
    %c2_106 = arith.constant 2 : index
    %c2_107 = arith.constant 2 : index
    %c0_108 = arith.constant 0 : index
    %127 = vector.load %arg7[%c2_106, %c2_107, %c0_108] : memref<10x10x128xbf16, #tpu.memory_space<vmem>>, vector<8x8x128xbf16>
    %128 = vector.shape_cast %127 : vector<8x8x128xbf16> to vector<64x128xbf16>
    %c8_109 = arith.constant 8 : index
    %c0_110 = arith.constant 0 : index
    %c0_111 = arith.constant 0 : index
    %129 = vector.load %arg4[%c8_109, %c0_110, %c0_111] : memref<9x128x128xbf16, #tpu.memory_space<vmem>>, vector<1x128x128xbf16>
    %130 = vector.shape_cast %129 : vector<1x128x128xbf16> to vector<128x128xbf16>
    %cst_112 = arith.constant dense<0.000000e+00> : vector<64x128xf32>
    %131 = tpu.matmul %128, %130, %cst_112 {dimension_numbers = #tpu.dot_dimension_numbers<[1], [0], [0], [1], [0, 0, 1, 1], [], []>} : vector<64x128xbf16>, vector<128x128xbf16>, vector<64x128xf32> -> vector<64x128xf32>
    %132 = arith.addf %126, %131 : vector<64x128xf32>
    %c0_113 = arith.constant 0 : index
    %c0_114 = arith.constant 0 : index
    %133 = vector.load %arg5[%c0_113, %c0_114] : memref<1x128xf32, #tpu.memory_space<vmem>>, vector<1x128xf32>
    %134 = vector.broadcast %133 : vector<1x128xf32> to vector<64x128xf32>
    %135 = arith.addf %132, %134 : vector<64x128xf32>
    %cst_115 = arith.constant 0.000000e+00 : f32
    %136 = vector.broadcast %cst_115 : f32 to vector<64x128xf32>
    %137 = arith.maximumf %135, %136 : vector<64x128xf32>
    %138 = arith.truncf %137 : vector<64x128xf32> to vector<64x128xbf16>
    %c0_116 = arith.constant 0 : index
    %c0_117 = arith.constant 0 : index
    %c0_118 = arith.constant 0 : index
    %139 = vector.load %arg6[%c0_116, %c0_117, %c0_118] : memref<1x64x128xbf16, #tpu.memory_space<vmem>>, vector<1x64x128xbf16>
    %140 = vector.shape_cast %139 : vector<1x64x128xbf16> to vector<64x128xbf16>
    %141 = vector.shape_cast %138 : vector<64x128xbf16> to vector<1x64x128xbf16>
    tpu.vector_store %arg6[%c0_116, %c0_117, %c0_118], %141 {strides = array<i32>} : memref<1x64x128xbf16, #tpu.memory_space<vmem>>, vector<1x64x128xbf16>,
    return
  }
  func.func @transform_0(%arg0: i32) -> (i32, i32, i32, i32, i32) {
    %c0_i32 = arith.constant 0 : i32
    %c0_i32_0 = arith.constant 0 : i32
    %c0_i32_1 = arith.constant 0 : i32
    %c0_i32_2 = arith.constant 0 : i32
    %c0_i32_3 = arith.constant 0 : i32
    return %arg0, %c0_i32, %c0_i32_0, %c0_i32_1, %c0_i32_2 : i32, i32, i32, i32, i32
  }
  func.func @transform_1(%arg0: i32) -> (i32, i32, i32) {
    %c0_i32 = arith.constant 0 : i32
    %c0_i32_0 = arith.constant 0 : i32
    %c0_i32_1 = arith.constant 0 : i32
    %c0_i32_2 = arith.constant 0 : i32
    return %c0_i32, %c0_i32_0, %c0_i32_1 : i32, i32, i32
  }
  func.func @transform_2(%arg0: i32) -> (i32, i32) {
    %c0_i32 = arith.constant 0 : i32
    %c0_i32_0 = arith.constant 0 : i32
    %c0_i32_1 = arith.constant 0 : i32
    return %c0_i32, %c0_i32_0 : i32, i32
  }
  func.func @transform_3(%arg0: i32) -> (i32, i32, i32) {
    %c0_i32 = arith.constant 0 : i32
    %c0_i32_0 = arith.constant 0 : i32
    %c0_i32_1 = arith.constant 0 : i32
    %c0_i32_2 = arith.constant 0 : i32
    return %c0_i32, %c0_i32_0, %c0_i32_1 : i32, i32, i32
  }
  func.func @transform_4(%arg0: i32) -> (i32, i32) {
    %c0_i32 = arith.constant 0 : i32
    %c0_i32_0 = arith.constant 0 : i32
    %c0_i32_1 = arith.constant 0 : i32
    return %c0_i32, %c0_i32_0 : i32, i32
  }
  func.func @transform_5(%arg0: i32) -> (i32, i32, i32) {
    %c0_i32 = arith.constant 0 : i32
    %c0_i32_0 = arith.constant 0 : i32
    %c0_i32_1 = arith.constant 0 : i32
    return %arg0, %c0_i32, %c0_i32_0 : i32, i32, i32
  }
}

</mosaic_0001>

<bundles_post_ra>
// kernel: tpu_custom_call.1
= control target key start
LH: loop header
LB: loop body
LE: loop exit
PB: predicated region body
PF: predicated region fallthrough
CT: control target
= control target key end

     0   :  { %10 = vsyncpa [#allocation4], 0  ;;  %s5978_s0 = inlined_call_operand.vmem [shape: bf16[2,4,10,10,4], index: 0, kind: input, shape index: {}]   ;;  %s5979_s1 = inlined_call_operand.vmem [shape: bf16[9,4,128], index: 1, kind: input, shape index: {}]   ;;  %s5980_s2 = inlined_call_operand.vmem [shape: f32[1,128], index: 2, kind: input, shape index: {}]   ;;  %s5981_s3 = inlined_call_operand.vmem [shape: bf16[9,128,128], index: 3, kind: input, shape index: {}]   ;;  %s5982_s4 = inlined_call_operand.vmem [shape: f32[1,128], index: 4, kind: input, shape index: {}]   ;;  %s5983_s5 = inlined_call_operand.hbm [shape: bf16[2,64,128], index: 5, kind: output, shape index: {}]  }
   0x1   :  { %12 = vsyncpa [#allocation4 + $0x1], 0  ;;  %s4844_s18 = smov 0   ;;  %s4846_s19 = smov 0  }
   0x2   :  { %s4848_s20 = smov 0   ;;  %s4850_s21 = smov 0  }
   0x3 LB: > { %s4865_s22 = sadd.s32 4294967295, %s4808_s21   ;;  %s3740_s23 = sadd.s32 4294967294, %s4808_s21   ;;  %s4808_s21 = sphi %s4850_s21, %s6032_s21   ;;  %s4804_s20 = sphi %s4848_s20, %s6031_s20   ;;  %s4800_s19 = sphi %s4846_s19, %s6030_s19   ;;  %s4796_s18 = sphi %s4844_s18, %s6029_s18  }
   0x4   : > { %s4869_s24 = sadd.s32 1, %s4808_s21   ;;  %s135_s25 = sadd.s32 1, %s4804_s20 }
   0x5   : > { %s132_s26 = ssub.s32 %s4808_s21, %s4869_s24  ;;  %p145_p0 = scmp.ne.s32.totalorder %s4804_s20, %s4800_s19 }
   0x6   : > { %p133_p1 = scmp.eq.s32.totalorder %s132_s26, 0  ;;  %p146_p2 = scmp.eq.s32.totalorder %s4865_s22, 1 }
   0x7   : > { %p151_p3 = scmp.ne.s32.totalorder %s4800_s19, %s4796_s18  ;;  %p152_p4 = scmp.eq.s32.totalorder %s3740_s23, 1 }
   0x8   : > { %s4880_s27 = scalar_select %p133_p1, %s4804_s20, %s135_s25  }
   0x9   : > { %p4882_p5 = por %p146_p2, %p145_p0  ;;  %p4886_p6 = por %p152_p4, %p151_p3 }
   0xa   : > { %p3743_p7 = scmp.ge.s32.totalorder %s4808_s21, 1  ;;  %p190_p8 = scmp.lt.s32.totalorder %s4808_s21, 3 }
   0xc   : > { %p191_p9 = pnand %p3743_p7, %p190_p8 }
   0xe   : > { %194 = sbr.rel (%p191_p9) target bundleno = 733 (0x2dd), region = 40 }
  0x13   : > { %v3746_v0 = vld [vmem:[%s5979_s1 + $0x2] sm:$0x3]  ;;  %vm507_vm0 = vcmask 1041408   ;;  %p218_p10 = scmp.lt.s32.totalorder %s4865_s22, 1  ;;  %v364_v2 = vld [vmem:[%s5979_s1] sm:$0x3] }
  0x14   : > { %4611 = vmatprep.subr.msk.bf16.mxu0 %vm507_vm0, %v3746_v0  ;;  %v509_v1 = vsel %vm507_vm0, %v3746_v0, 0  ;;  %v4903_v3 = vsel %vm507_vm0, %v364_v2, 0  ;;  %4613 = vmatprep.subr.msk.bf16.mxu1 %vm507_vm0, %v364_v2  ;;  %v3780_v4 = vld [vmem:[%s5979_s1 + $0x6] sm:$0x3]  ;;  %v4915_v5 = vld [vmem:[%s5979_s1 + $0x4] sm:$0x3] }
  0x15   : > { %4304 = vmatpush3.bf16.msra.mxu0 %v509_v1  ;;  %s219_s9 = scalar_select %p218_p10, %s4865_s22, 1  ;;  %4610 = vmatpush3.bf16.msra.mxu1 %v4903_v3  ;;  %v4920_v6 = vld [vmem:[%s5979_s1 + $0x8] sm:$0x3]  ;;  %v4925_v7 = vld [vmem:[%s5979_s1 + $0xa] sm:$0x3]  ;;  %v4939_v9 = vsel %vm507_vm0, %v4915_v5, 0 }
  0x16   : > { %4612 = vmatprep.subr.msk.bf16.mxu0 %vm507_vm0, %v364_v2  ;;  %4615 = vmatprep.subr.msk.bf16.mxu1 %vm507_vm0, %v3780_v4  ;;  %v4930_v8 = vld [vmem:[%s5979_s1 + $0xc] sm:$0x3]  ;;  %v4942_v10 = vsel %vm507_vm0, %v3780_v4, 0  ;;  %v4946_v11 = vsel %vm507_vm0, %v4920_v6, 0  ;;  %v4950_v12 = vsel %vm507_vm0, %v4925_v7, 0  ;;  %vm494_vm3 = vcmask 31744  }
  0x17   : > { %s4621_s12 = smul.u32 320, %s219_s9  ;;  %v4954_v13 = vsel %vm507_vm0, %v4930_v8, 0  ;;  %vm365_vm1 = vsmask.f32 3328  ;;  %vm366_vm2 = vsmask.f32 7440 }
  0x18   : > { %vm5034_vm4 = vmor %vm365_vm1, %vm366_vm2  ;;  %vm684_vm5 = vcmask 1042432   ;;  %vm685_vm6 = vcmask 1046532   ;;  %vm1424_vm8 = vcmask 1040384   ;;  %vm1425_vm9 = vsmask.f32 256  ;;  %s215_s16 = sand.u32 1, %s4800_s19  }
  0x19   : > { %s4935_s7 = scalar_lea.vmem %s5978_s0, %s4621_s12  ;;  %vm5159_vm7 = vmor %vm684_vm5, %vm685_vm6  ;;  %vm1451_vm10 = vsmask.f32 7938  ;;  %vm1589_vm13 = vcmask 1043456   ;;  %s3744_s17 = sshll.u32 %s215_s16, 5 }
  0x1a   : > { %v224_v14 = vld [vmem:[%s4935_s7] sm:$0xf]  ;;  %v225_v15 = vld [vmem:[%s4935_s7 + $0x4] sm:$0x1]  ;;  %v226_v16 = vld [vmem:[%s4935_s7 + $0x8] sm:$0xf] }
  0x1b   : > { %v244_v17 = vld [vmem:[%s4935_s7 + $0x50] sm:$0xf]  ;;  %v245_v18 = vld [vmem:[%s4935_s7 + $0x54] sm:$0x1]  ;;  %v227_v19 = vld [vmem:[%s4935_s7 + $0xc] sm:$0x1] }
  0x1c   : > { %v228_v20 = vld [vmem:[%s4935_s7 + $0x10] sm:$0xf]  ;;  %v229_v21 = vld [vmem:[%s4935_s7 + $0x14] sm:$0x1]  ;;  %v230_v22 = vld [vmem:[%s4935_s7 + $0x18] sm:$0xf]  ;;  %v304_v43 = vmax.bf16 %v244_v17, %v224_v14  ;;  %v305_v44 = vmax.bf16 %v245_v18, %v225_v15 }
  0x1d   : > { %v246_v23 = vld [vmem:[%s4935_s7 + $0x58] sm:$0xf]  ;;  %v247_v24 = vld [vmem:[%s4935_s7 + $0x5c] sm:$0x1]  ;;  %v248_v25 = vld [vmem:[%s4935_s7 + $0x60] sm:$0xf] }
  0x1e   : > { %v231_v26 = vld [vmem:[%s4935_s7 + $0x1c] sm:$0x1]  ;;  %v249_v27 = vld [vmem:[%s4935_s7 + $0x64] sm:$0x1]  ;;  %v250_v28 = vld [vmem:[%s4935_s7 + $0x68] sm:$0xf]  ;;  %v306_v45 = vmax.bf16 %v246_v23, %v226_v16  ;;  %v307_v50 = vmax.bf16 %v247_v24, %v227_v19  ;;  %v308_v51 = vmax.bf16 %v248_v25, %v228_v20 }
  0x1f   : > { %v251_v29 = vld [vmem:[%s4935_s7 + $0x6c] sm:$0x1]  ;;  %v232_v30 = vld [vmem:[%s4935_s7 + $0x20] sm:$0xf]  ;;  %v252_v31 = vld [vmem:[%s4935_s7 + $0x70] sm:$0xf]  ;;  %v309_v52 = vmax.bf16 %v249_v27, %v229_v21  ;;  %v310_v53 = vmax.bf16 %v250_v28, %v230_v22 }
  0x20   : > { %v264_v32 = vld [vmem:[%s4935_s7 + $0xa0] sm:$0xf]  ;;  %v265_v33 = vld [vmem:[%s4935_s7 + $0xa4] sm:$0x1]  ;;  %v266_v34 = vld [vmem:[%s4935_s7 + $0xa8] sm:$0xf]  ;;  %v311_v57 = vmax.bf16 %v251_v29, %v231_v26  ;;  %v312_v0 = vmax.bf16 %v252_v31, %v232_v30 }
  0x21   : > { %v267_v35 = vld [vmem:[%s4935_s7 + $0xac] sm:$0x1]  ;;  %v268_v36 = vld [vmem:[%s4935_s7 + $0xb0] sm:$0xf]  ;;  %v269_v37 = vld [vmem:[%s4935_s7 + $0xb4] sm:$0x1] }
  0x22   : > { %v4981_v38 = vld [vmem:[%s4935_s7 + $0x24] sm:$0x1]  ;;  %v4984_v39 = vld [vmem:[%s4935_s7 + $0x74] sm:$0x1]  ;;  %v270_v40 = vld [vmem:[%s4935_s7 + $0xb8] sm:$0xf] }
  0x23   : > { %v271_v41 = vld [vmem:[%s4935_s7 + $0xbc] sm:$0x1]  ;;  %v272_v42 = vld [vmem:[%s4935_s7 + $0xc0] sm:$0xf]  ;;  %v4990_v46 = vld [vmem:[%s4935_s7 + $0xc4] sm:$0x1]  ;;  %v313_v19 = vmax.bf16 %v4984_v39, %v4981_v38 }
  0x24   : > { %v284_v47 = vld [vmem:[%s4935_s7 + $0xf0] sm:$0xf]  ;;  %v285_v48 = vld [vmem:[%s4935_s7 + $0xf4] sm:$0x1]  ;;  %v286_v49 = vld [vmem:[%s4935_s7 + $0xf8] sm:$0xf] }
  0x25   : > { %v287_v54 = vld [vmem:[%s4935_s7 + $0xfc] sm:$0x1]  ;;  %v288_v55 = vld [vmem:[%s4935_s7 + $0x100] sm:$0xf]  ;;  %v289_v56 = vld [vmem:[%s4935_s7 + $0x104] sm:$0x1]  ;;  %v324_v58 = vmax.bf16 %v284_v47, %v264_v32  ;;  %v325_v59 = vmax.bf16 %v285_v48, %v265_v33  ;;  %v326_v60 = vmax.bf16 %v286_v49, %v266_v34 }
  0x26   : > { %v290_v61 = vld [vmem:[%s4935_s7 + $0x108] sm:$0xf]  ;;  %v291_v62 = vld [vmem:[%s4935_s7 + $0x10c] sm:$0x1]  ;;  %v292_v63 = vld [vmem:[%s4935_s7 + $0x110] sm:$0xf]  ;;  %v327_v1 = vmax.bf16 %v287_v54, %v267_v35  ;;  %v328_v2 = vmax.bf16 %v288_v55, %v268_v36  ;;  %v329_v4 = vmax.bf16 %v289_v56, %v269_v37 }
  0x27   : > { %v293_v14 = vld [vmem:[%s4935_s7 + $0x114] sm:$0x1]  ;;  %v330_v15 = vmax.bf16 %v290_v61, %v270_v40  ;;  %v331_v16 = vmax.bf16 %v291_v62, %v271_v41  ;;  %v332_v17 = vmax.bf16 %v292_v63, %v272_v42  ;;  %v5002_v18 = vmax.bf16 %v324_v58, %v304_v43  ;;  %v5047_v56 = vld [vmem:[%s5979_s1 + $0xe] sm:$0x3]  ;;  %v234_v61 = vld [vmem:[%s4935_s7 + $0x28] sm:$0xf] }
  0x28   : > { %v5006_v20 = vmax.bf16 %v325_v59, %v305_v44  ;;  %v5008_v21 = vmax.bf16 %v326_v60, %v306_v45  ;;  %v5010_v22 = vmax.bf16 %v327_v1, %v307_v50  ;;  %v333_v23 = vmax.bf16 %v293_v14, %v4990_v46  ;;  %v235_v62 = vld [vmem:[%s4935_s7 + $0x2c] sm:$0x1]  ;;  %v254_v63 = vld [vmem:[%s4935_s7 + $0x78] sm:$0xf]  ;;  %v274_v14 = vld [vmem:[%s4935_s7 + $0xc8] sm:$0xf] }
  0x29   : > { %v5013_v24 = vmax.bf16 %v328_v2, %v308_v51  ;;  %v5015_v25 = vmax.bf16 %v329_v4, %v309_v52  ;;  %v5017_v26 = vmax.bf16 %v330_v15, %v310_v53  ;;  %v5019_v27 = vmax.bf16 %v331_v16, %v311_v57  ;;  %v275_v15 = vld [vmem:[%s4935_s7 + $0xcc] sm:$0x1]  ;;  %v294_v16 = vld [vmem:[%s4935_s7 + $0x118] sm:$0xf]  ;;  %vm5328_vm11 = vmand %vm1424_vm8, %vm1425_vm9  ;;  %s217_s23 = scalar_lea.vmem [#allocation3], %s3744_s17  ;;  %s4126_s26 = sshll.u32 %s4865_s22, 9 }
  0x2a   : > { %v5021_v28 = vmax.bf16 %v332_v17, %v312_v0  ;;  %v369_v29 = vshrl.u32 %v5002_v18, 16  ;;  %v372_v30 = vshll.u32 %v5002_v18, 16  ;;  %v378_v31 = vshll.u32 %v5006_v20, 16  ;;  %v255_v0 = vld [vmem:[%s4935_s7 + $0x7c] sm:$0x1]  ;;  %vm5335_vm12 = vmand %vm1424_vm8, %vm1451_vm10  ;;  %s3678_s25 = sshll.u32 %s217_s23, 4  ;;  %s5934_s25 = int_to_ptr.vmem [resolvable:$true] %s3678_s25 }
  0x2b   : > { %v383_v32 = vshrl.u32 %v5008_v21, 16  ;;  %v386_v33 = vshll.u32 %v5008_v21, 16  ;;  %v392_v34 = vshll.u32 %v5010_v22, 16  ;;  %v397_v37 = vshrl.u32 %v5013_v24, 16  ;;  %v295_v17 = vld [vmem:[%s4935_s7 + $0x11c] sm:$0x1]  ;;  %vm5487_vm14 = vmand %vm1589_vm13, %vm1451_vm10 }
  0x2c   : > { %v371_v35 = vrot.slane %v369_v29, 4  ;;  %v374_v36 = vrot.slane %v372_v30, 5  ;;  %v400_v38 = vshll.u32 %v5013_v24, 16  ;;  %v380_v39 = vrot.slane %v378_v31, 5  ;;  %v236_v31 = vld [vmem:[%s4935_s7 + $0x30] sm:$0xf] }
  0x2d   : > { %v385_v40 = vrot.slane %v383_v32, 4  ;;  %v388_v41 = vrot.slane %v386_v33, 5  ;;  %v394_v42 = vrot.slane %v392_v34, 5  ;;  %v399_v44 = vrot.slane %v397_v37, 4  ;;  %v237_v32 = vld [vmem:[%s4935_s7 + $0x34] sm:$0x1] }
  0x2e   : > { %v375_v43 = vor.u32 %v374_v36, %v371_v35  ;;  %v402_v45 = vrot.slane %v400_v38, 5  ;;  %v406_v46 = vshll.u32 %v5015_v25, 16  ;;  %v5994_v47 = vmov 0  ;;  %v238_v33 = vld [vmem:[%s4935_s7 + $0x38] sm:$0xf]  ;;  %s5938_s8 = scalar_lea.sflag [#allocation4], %s215_s16 }
  0x2f   : > { %v5995_v47 = vsel %vm5034_vm4, 4294967295, %v5994_v47  ;;  %v389_v48 = vor.u32 %v388_v41, %v385_v40  ;;  %v411_v49 = vshrl.u32 %v5017_v26, 16  ;;  %v414_v50 = vshll.u32 %v5017_v26, 16  ;;  %v256_v34 = vld [vmem:[%s4935_s7 + $0x80] sm:$0xf]  ;;  %s4748_s22 = scalar_lea.vmem %s5934_s25, 512 }
  0x30   : > { %5996 = vst [vmem:[#allocation6_spill] sm:$0xff] %v5995_v47  ;;  %v420_v51 = vshll.u32 %v5019_v27, 16  ;;  %v5041_v52 = vmax.bf16 %v333_v23, %v313_v19  ;;  %v376_v53 = vrot.slane %v375_v43, 4  ;;  %v403_v54 = vor.u32 %v402_v45, %v399_v44  ;;  %v257_v35 = vld [vmem:[%s4935_s7 + $0x84] sm:$0x1]  ;;  %p4749_p11 = scmp.ne.s32.totalorder %s5934_s25, %s4748_s22  ;;  %s4811_s9 = smov [#allocation3]  }
  0x31   : > { %v425_v55 = vshrl.u32 %v5021_v28, 16  ;;  %v390_v57 = vrot.slane %v389_v48, 4  ;;  %v408_v58 = vrot.slane %v406_v46, 5  ;;  %v413_v59 = vrot.slane %v411_v49, 4  ;;  %v239_v38 = vld [vmem:[%s4935_s7 + $0x3c] sm:$0x1] }
  0x32   : > { %v416_v60 = vrot.slane %v414_v50, 5  ;;  %v381_v1 = vsel %vm5034_vm4, %v376_v53, %v380_v39  ;;  %v404_v2 = vrot.slane %v403_v54, 4  ;;  %v428_v4 = vshll.u32 %v5021_v28, 16  ;;  %v258_v39 = vld [vmem:[%s4935_s7 + $0x88] sm:$0xf]  ;;  %p4750_p12 = pnand %p4749_p11, %p4882_p5  ;;  %s4752_s10 = sshll.u32 %s4811_s9, 4  ;;  %s4753_s10 = int_to_ptr.vmem [resolvable:$false] %s4752_s10 }
  0x33   : > { %v5062_v19 = vsel %vm5034_vm4, %v390_v57, %v394_v42  ;;  %v422_v29 = vrot.slane %v420_v51, 5  ;;  %v427_v30 = vrot.slane %v425_v55, 4  ;;  %v259_v40 = vld [vmem:[%s4935_s7 + $0x8c] sm:$0x1]  ;;  %v5075_v41 = vsel %vm507_vm0, %v5047_v56, 0  ;;  %s4754_s11 = scalar_lea.vmem %s4753_s10, 1024  ;;  %p4755_p0 = scmp.lt.s32.totalorder %s5934_s25, %s4753_s10 }
  0x34   : > { %v417_v23 = vor.u32 %v416_v60, %v413_v59  ;;  %v430_v36 = vrot.slane %v428_v4, 5  ;;  %v3747_v37 = vcombine.low %v381_v1, %v5062_v19  ;;  %v5079_v42 = vsel %vm5034_vm4, %v404_v2, %v408_v58  ;;  %v276_v45 = vld [vmem:[%s4935_s7 + $0xd0] sm:$0xf]  ;;  %v277_v46 = vld [vmem:[%s4935_s7 + $0xd4] sm:$0x1]  ;;  %p4751_p13 = pneg %p4750_p12  ;;  %p4756_p1 = scmp.lt.s32.totalorder %s4754_s11, %s4748_s22 }
  0x35   : > { %v434_v44 = vshll.u32 %v5041_v52, 16  ;;  %v314_v48 = vmax.bf16 %v254_v63, %v234_v61  ;;  %v315_v49 = vmax.bf16 %v255_v0, %v235_v62  ;;  %v278_v50 = vld [vmem:[%s4935_s7 + $0xd8] sm:$0xf]  ;;  %v279_v51 = vld [vmem:[%s4935_s7 + $0xdc] sm:$0x1]  ;;  %v334_v57 = vmax.bf16 %v294_v16, %v274_v14 }
  0x36   : > { %v418_v43 = vrot.slane %v417_v23, 4  ;;  %4305 = vmatprep.mubr.msk.bf16.mxu0 %vm494_vm3, %v3747_v37  ;;  %v296_v53 = vld [vmem:[%s4935_s7 + $0x120] sm:$0xf]  ;;  %v431_v55 = vor.u32 %v430_v36, %v427_v30  ;;  %v335_v58 = vmax.bf16 %v295_v17, %v275_v15  ;;  %v297_v59 = vld [vmem:[%s4935_s7 + $0x124] sm:$0x1]  ;;  %v316_v4 = vmax.bf16 %v256_v34, %v236_v31  ;;  %p4757_p2 = por %p4756_p1, %p4755_p0 }
  0x37   : > { %v298_v60 = vld [vmem:[%s4935_s7 + $0x128] sm:$0xf]  ;;  %v299_v1 = vld [vmem:[%s4935_s7 + $0x12c] sm:$0x1]  ;;  %v317_v61 = vmax.bf16 %v257_v35, %v237_v32  ;;  %v318_v62 = vmax.bf16 %v258_v39, %v238_v33  ;;  %v5099_v63 = vmax.bf16 %v334_v57, %v314_v48  ;;  %v319_v23 = vmax.bf16 %v259_v40, %v239_v38 }
  0x38   : > { %v5090_v54 = vsel %vm5034_vm4, %v418_v43, %v422_v29  ;;  %v5101_v0 = vmax.bf16 %v335_v58, %v315_v49  ;;  %v336_v29 = vmax.bf16 %v296_v53, %v276_v45  ;;  %v436_v37 = vrot.slane %v434_v44, 5  ;;  %p4758_p3 = pnand %p4757_p2, %p4751_p13 }
  0x39   : > { %v5097_v2 = vcombine.low %v5079_v42, %v5090_v54  ;;  %v337_v14 = vmax.bf16 %v297_v59, %v277_v46  ;;  %v338_v15 = vmax.bf16 %v298_v60, %v278_v50  ;;  %v339_v16 = vmax.bf16 %v299_v1, %v279_v51 }
  0x3a   : > { %v432_v17 = vrot.slane %v431_v55, 4  ;;  %v439_v30 = vshrl.u32 %v5099_v63, 16  ;;  %v442_v31 = vshll.u32 %v5099_v63, 16  ;;  %v448_v32 = vshll.u32 %v5101_v0, 16 }
  0x3b   : > { %4306 = vmatmul.mubr.msk.bf16.vlgmr.msra.gmra.mxu0 %vm494_vm3, %v5097_v2  ;;  %v5111_v33 = vcombine.low %v5021_v28, %v5099_v63  ;;  %v5113_v34 = vmax.bf16 %v336_v29, %v316_v4  ;;  %v5115_v35 = vmax.bf16 %v337_v14, %v317_v61  ;;  %v5117_v36 = vmax.bf16 %v338_v15, %v318_v62 }
  0x3c   : > { %4314 = vmatpush3.bf16.msra.mxu0 %v4903_v3  ;;  %v441_v3 = vrot.slane %v439_v30, 4  ;;  %v444_v38 = vrot.slane %v442_v31, 5  ;;  %v450_v39 = vrot.slane %v448_v32, 5  ;;  %v5121_v40 = vmax.bf16 %v339_v16, %v319_v23 }
  0x3d   : > { %4614 = vmatprep.subr.msk.bf16.mxu0 %vm507_vm0, %v4915_v5  ;;  %4319 = vmatprep.mubr.msk.bf16.mxu1 %vm494_vm3, %v5111_v33  ;;  %v453_v43 = vshrl.u32 %v5113_v34, 16  ;;  %v456_v44 = vshll.u32 %v5113_v34, 16  ;;  %v462_v45 = vshll.u32 %v5115_v35, 16  ;;  %v467_v46 = vshrl.u32 %v5117_v36, 16 }
  0x3e   : > { %v445_v48 = vor.u32 %v444_v38, %v441_v3  ;;  %v470_v49 = vshll.u32 %v5117_v36, 16  ;;  %v476_v5 = vshll.u32 %v5121_v40, 16  ;;  %v5133_v50 = vcombine.low %v5113_v34, %v5117_v36  ;;  %v280_v3 = vld [vmem:[%s4935_s7 + $0xe0] sm:$0xf]  ;;  %v300_v38 = vld [vmem:[%s4935_s7 + $0x130] sm:$0xf] }
  0x3f   : > { %v689_v51 = vrot.slane %v5006_v20, 5  ;;  %v455_v53 = vrot.slane %v453_v43, 4  ;;  %v458_v55 = vrot.slane %v456_v44, 5  ;;  %v469_v57 = vrot.slane %v467_v46, 4  ;;  %v241_v46 = vld [vmem:[%s4935_s7 + $0x44] sm:$0x1] }
  0x40   : > { %v5138_v58 = vsel %vm5034_vm4, %v432_v17, %v436_v37  ;;  %v693_v59 = vrot.slane %v5010_v22, 5  ;;  %v446_v60 = vrot.slane %v445_v48, 4  ;;  %v472_v1 = vrot.slane %v470_v49, 5  ;;  %4320 = vmatmul.mubr.msk.bf16.vlgmr.msra.gmra.mxu1 %vm494_vm3, %v5133_v50  ;;  %v240_v17 = vld [vmem:[%s4935_s7 + $0x40] sm:$0xf] }
  0x41   : > { %v697_v4 = vrot.slane %v5015_v25, 5  ;;  %v459_v61 = vor.u32 %v458_v55, %v455_v53  ;;  %v464_v20 = vrot.slane %v462_v45, 5  ;;  %4334 = vmatpush3.bf16.msra.mxu1 %v4942_v10  ;;  %v478_v29 = vrot.slane %v476_v5, 5  ;;  %v261_v48 = vld [vmem:[%s4935_s7 + $0x94] sm:$0x1] }
  0x42   : > { %v5148_v23 = vsel %vm5034_vm4, %v446_v60, %v450_v39  ;;  %v473_v22 = vor.u32 %v472_v1, %v469_v57  ;;  %4617 = vmatprep.subr.msk.bf16.mxu1 %vm507_vm0, %v4925_v7  ;;  %v3763_v10 = vrot.slane %v5002_v18, 9  ;;  %v5997_v15 = vmov 0  ;;  %v260_v7 = vld [vmem:[%s4935_s7 + $0x90] sm:$0xf]  ;;  %v281_v53 = vld [vmem:[%s4935_s7 + $0xe4] sm:$0x1] }
  0x43   : > { %v5154_v25 = vcombine.low %v5138_v58, %v5148_v23  ;;  %v460_v37 = vrot.slane %v459_v61, 4  ;;  %v5998_v15 = vsel %vm5159_vm7, 4294967295, %v5997_v15  ;;  %v3764_v16 = vrot.slane %v5008_v21, 9  ;;  %v301_v55 = vld [vmem:[%s4935_s7 + $0x134] sm:$0x1] }
  0x44   : > { %v474_v14 = vrot.slane %v473_v22, 4  ;;  %5999 = vst [vmem:[#allocation7_spill] sm:$0xff] %v5998_v15  ;;  %v3781_v31 = vcombine.low %v5008_v21, %v5013_v24  ;;  %v3782_v32 = vcombine.low %v5017_v26, %v5021_v28  ;;  %v3755_v43 = vcombine.low %v5002_v18, %v5008_v21  ;;  %v242_v57 = vld [vmem:[%s4935_s7 + $0x48] sm:$0xf]  ;;  %v262_v60 = vld [vmem:[%s4935_s7 + $0x98] sm:$0xf] }
  0x45   : > { %4309 = vmatprep.mubr.msk.bf16.mxu0 %vm494_vm3, %v5154_v25  ;;  %v5170_v30 = vsel %vm5034_vm4, %v460_v37, %v464_v20  ;;  %v3765_v44 = vrot.slane %v5013_v24, 9  ;;  %v3766_v45 = vrot.slane %v5017_v26, 9  ;;  %v690_v5 = vsel %vm5159_vm7, %v3763_v10, %v689_v51  ;;  %v302_v22 = vld [vmem:[%s4935_s7 + $0x138] sm:$0xf]  ;;  %v283_v37 = vld [vmem:[%s4935_s7 + $0xec] sm:$0x1] }
  0x46   : > { %v5180_v39 = vsel %vm5034_vm4, %v474_v14, %v478_v29  ;;  %4335 = vmatprep.mubr.msk.bf16.mxu1 %vm494_vm3, %v3781_v31  ;;  %v3767_v18 = vrot.slane %v5021_v28, 9  ;;  %v705_v21 = vrot.slane %v5041_v52, 5  ;;  %v694_v1 = vsel %vm5159_vm7, %v3764_v16, %v693_v59  ;;  %v282_v28 = vld [vmem:[%s4935_s7 + $0xe8] sm:$0xf]  ;;  %v243_v29 = vld [vmem:[%s4935_s7 + $0x4c] sm:$0x1] }
  0x47   : > { %v5190_v49 = vcombine.low %v5170_v30, %v5180_v39  ;;  %v3768_v51 = vrot.slane %v5099_v63, 9  ;;  %v709_v61 = vrot.slane %v5101_v0, 5  ;;  %v3783_v20 = vcombine.low %v5099_v63, %v5113_v34  ;;  %v263_v52 = vld [vmem:[%s4935_s7 + $0x9c] sm:$0x1] }
  0x48   : > { %4336 = vmatmul.mubr.msk.bf16.vlgmr.msra.gmra.mxu1 %vm494_vm3, %v3782_v32  ;;  %v303_v10 = vld [vmem:[%s4935_s7 + $0x13c] sm:$0x1]  ;;  %v320_v14 = vmax.bf16 %v260_v7, %v240_v17  ;;  %v340_v59 = vmax.bf16 %v300_v38, %v280_v3  ;;  %v5220_v0 = vcombine.low %v5013_v24, %v5017_v26  ;;  %v3772_v63 = vcombine.low %v690_v5, %v694_v1  ;;  %s5932_s7 = scalar_lea.hbm %s5983_s5, %s4126_s26 }
  0x49   : > { %4310 = vmatmul.mubr.msk.bf16.gmra.mxu0 %vm494_vm3, %v5190_v49  ;;  %4339 = vmatprep.mubr.msk.bf16.mxu1 %vm494_vm3, %v3783_v20  ;;  %v321_v16 = vmax.bf16 %v261_v48, %v241_v46  ;;  %v698_v31 = vsel %vm5159_vm7, %v3765_v44, %v697_v4  ;;  %v341_v62 = vmax.bf16 %v301_v55, %v281_v53  ;;  %v6000_v4 = vrot.slane %v5019_v27, 5 }
  0x4a   : > { %4315 = vmatprep.mubr.msk.bf16.mxu0 %vm494_vm3, %v3755_v43  ;;  %4354 = vmatpush3.bf16.msra.mxu1 %v4950_v12  ;;  %v5225_v32 = vmax.bf16 %v340_v59, %v320_v14  ;;  %v322_v17 = vmax.bf16 %v262_v60, %v242_v57  ;;  %v3800_v7 = vcombine.low %v694_v1, %v698_v31  ;;  %v713_v53 = vrot.slane %v5115_v35, 5 }
  0x4b   : > { %4619 = vmatprep.subr.msk.bf16.mxu1 %vm507_vm0, %v5047_v56  ;;  %v342_v3 = vmax.bf16 %v302_v22, %v282_v28  ;;  %v323_v38 = vmax.bf16 %v263_v52, %v243_v29  ;;  %v343_v43 = vmax.bf16 %v303_v10, %v283_v37  ;;  %v361_v26 = vmax.bf16 %v341_v62, %v321_v16 }
  0x4c   : > { %v3784_v24 = vcombine.low %v5117_v36, %v5225_v32  ;;  %v918_v12 = vshrl.u32 %v5225_v32, 16  ;;  %v921_v46 = vshll.u32 %v5225_v32, 16  ;;  %v702_v44 = vsel %vm5159_vm7, %v3766_v45, %v6000_v4  ;;  %v4667_v4 = vld [vmem:[%s5981_s3 + $0x78] sm:$0xff]  }
  0x4d   : > { %v3769_v56 = vrot.slane %v5113_v34, 9  ;;  %v5238_v48 = vmax.bf16 %v342_v3, %v322_v17  ;;  %v5240_v5 = vmax.bf16 %v343_v43, %v323_v38  ;;  %v927_v57 = vshll.u32 %v361_v26, 16  ;;  %v4666_v38 = vld [vmem:[%s5981_s3 + $0x28] sm:$0xff]  }
  0x4e   : > { %v920_v62 = vrot.slane %v918_v12, 4  ;;  %v923_v55 = vrot.slane %v921_v46, 5  ;;  %v3770_v27 = vrot.slane %v5117_v36, 9  ;;  %v706_v35 = vsel %vm5159_vm7, %v3767_v18, %v705_v21 }
  0x4f   : > { %v1211_v34 = vshrl.u32 %v5238_v48, 16  ;;  %v1214_v45 = vshll.u32 %v5238_v48, 16  ;;  %v1220_v60 = vshll.u32 %v5240_v5, 16  ;;  %v710_v1 = vsel %vm5159_vm7, %v3768_v51, %v709_v61 }
  0x50   : > { %4340 = vmatmul.mubr.msk.bf16.gmra.mxu1 %vm494_vm3, %v3784_v24  ;;  %v717_v36 = vrot.slane %v5121_v40, 5  ;;  %v3798_v20 = vrot.slane %v5225_v32, 9  ;;  %v924_v28 = vor.u32 %v923_v55, %v920_v62  ;;  %v1029_v22 = vrot.slane %v361_v26, 5  ;;  %v1427_v24 = vld [vmem:[#allocation2 + $0x8] sm:$0x1] }
  0x51   : > { %4316 = vmatmul.mubr.msk.bf16.vlgmr.msra.gmra.mxu0 %vm494_vm3, %v5220_v0  ;;  %4355 = vmatprep.mubr.msk.bf16.mxu1 %vm494_vm3, %v3800_v7  ;;  %v1213_v29 = vrot.slane %v1211_v34, 4  ;;  %v1216_v52 = vrot.slane %v1214_v45, 5  ;;  %v714_v37 = vsel %vm5159_vm7, %v3769_v56, %v713_v53  ;;  %v929_v10 = vrot.slane %v927_v57, 5  ;;  %v1453_v26 = vld [vmem:[#allocation2 + $0xc] sm:$0x1]  ;;  %v4668_v53 = vld [vmem:[%s5981_s3 + $0x20] sm:$0xff]  }
  0x52   : > { %4324 = vmatpush3.bf16.msra.mxu0 %v4939_v9  ;;  %4325 = vmatprep.mubr.msk.bf16.mxu0 %vm494_vm3, %v3772_v63  ;;  %v3801_v9 = vcombine.low %v702_v44, %v706_v35  ;;  %v1222_v18 = vrot.slane %v1220_v60, 5  ;;  %v3773_v21 = vcombine.low %v698_v31, %v702_v44  ;;  %v3802_v14 = vcombine.low %v710_v1, %v714_v37  ;;  %v1436_v44 = vld [vmem:[#allocation2 + $0x20] sm:$0x1]  ;;  %v1462_v56 = vld [vmem:[#allocation2 + $0x24] sm:$0x1] }
  0x53   : > { %4616 = vmatprep.subr.msk.bf16.mxu0 %vm507_vm0, %v4920_v6  ;;  %v1217_v51 = vor.u32 %v1216_v52, %v1213_v29  ;;  %v3774_v61 = vcombine.low %v706_v35, %v710_v1  ;;  %v925_v40 = vrot.slane %v924_v28, 4  ;;  %v1030_v6 = vsel %vm5159_vm7, %v3798_v20, %v1029_v22  ;;  %v1430_v62 = vld [vmem:[#allocation2 + $0x10] sm:$0x1]  ;;  %v1456_v55 = vld [vmem:[#allocation2 + $0x14] sm:$0x1]  ;;  %v4670_v29 = vld [vmem:[%s5981_s3 + $0x18] sm:$0xff]  }
  0x54   : > { %v718_v63 = vsel %vm5159_vm7, %v3770_v27, %v717_v36  ;;  %v3790_v17 = vcombine.low %v5062_v19, %v5079_v42  ;;  %v1428_v12 = vsel %vm5328_vm11, 0, %v1427_v24  ;;  %v1454_v46 = vsel %vm5335_vm12, 0, %v1453_v26  ;;  %v1445_v34 = vld [vmem:[#allocation2 + $0x38] sm:$0x1]  ;;  %v1471_v60 = vld [vmem:[#allocation2 + $0x3c] sm:$0x1] }
  0x55   : > { %v1218_v59 = vrot.slane %v1217_v51, 4  ;;  %v3803_v16 = vcombine.low %v718_v63, %v1030_v6  ;;  %v3775_v31 = vcombine.low %v714_v37, %v718_v63  ;;  %v930_v42 = vsel %vm5034_vm4, %v925_v40, %v929_v10  ;;  %1429 = vst [vmem:[#allocation2 + $0x8] sm:$0x1] %v1428_v12  ;;  %1455 = vst [vmem:[#allocation2 + $0xc] sm:$0x1] %v1454_v46  ;;  %v4669_v35 = vld [vmem:[%s5981_s3 + $0x70] sm:$0xff]  }
  0x56   : > { %v1431_v57 = vsel %vm5328_vm11, 0, %v1430_v62  ;;  %v1457_v27 = vsel %vm5335_vm12, 0, %v1456_v55  ;;  %v1446_v45 = vsel %vm5328_vm11, 0, %v1445_v34  ;;  %v1472_v1 = vsel %vm5335_vm12, 0, %v1471_v60  ;;  %v1439_v36 = vld [vmem:[#allocation2 + $0x28] sm:$0x1] }
  0x57   : > { %v1223_v19 = vsel %vm5034_vm4, %v1218_v59, %v1222_v18  ;;  %1432 = vst [vmem:[#allocation2 + $0x10] sm:$0x1] %v1431_v57  ;;  %1458 = vst [vmem:[#allocation2 + $0x14] sm:$0x1] %v1457_v27  ;;  %v1465_v20 = vld [vmem:[#allocation2 + $0x2c] sm:$0x1] }
  0x58   : > { %4356 = vmatmul.mubr.msk.bf16.vlgmr.msra.gmra.mxu1 %vm494_vm3, %v3801_v9  ;;  %1447 = vst [vmem:[#allocation2 + $0x38] sm:$0x1] %v1446_v45  ;;  %1473 = vst [vmem:[#allocation2 + $0x3c] sm:$0x1] %v1472_v1  ;;  %v1440_v28 = vsel %vm5328_vm11, 0, %v1439_v36  ;;  %v1466_v22 = vsel %vm5335_vm12, 0, %v1465_v20 }
  0x59   : > { %4326 = vmatmul.mubr.msk.bf16.vlgmr.msra.gmra.mxu0 %vm494_vm3, %v3773_v21  ;;  %4359 = vmatprep.mubr.msk.bf16.mxu1 %vm494_vm3, %v3802_v14  ;;  %1441 = vst [vmem:[#allocation2 + $0x28] sm:$0x1] %v1440_v28  ;;  %1467 = vst [vmem:[#allocation2 + $0x2c] sm:$0x1] %v1466_v22  ;;  %v4671_v52 = vld [vmem:[%s5981_s3 + $0x68] sm:$0xff]   ;;  %v4672_v18 = vld [vmem:[%s5981_s3 + $0x10] sm:$0xff]  }
  0x5a   : > { %4344 = vmatpush3.bf16.msra.mxu0 %v4946_v11  ;;  %4329 = vmatprep.mubr.msk.bf16.mxu0 %vm494_vm3, %v3774_v61  ;;  %v3791_v11 = vcombine.low %v5090_v54, %v5138_v58  ;;  %v3815_v54 = vcombine.low %v930_v42, %v1223_v19  ;;  %v1448_v9 = vld [vmem:[#allocation2 + $0x40] sm:$0x1]  ;;  %v1474_v10 = vld [vmem:[#allocation2 + $0x44] sm:$0x1]  ;;  %v4810_v51 = vmov 0   ;;  %v4674_v63 = vld [vmem:[%s5981_s3 + $0x8] sm:$0xff]  }
  0x5b   : > { %4618 = vmatprep.subr.msk.bf16.mxu0 %vm507_vm0, %v4930_v8  ;;  %4374 = vmatpush3.bf16.msra.mxu1 %v5075_v41  ;;  %v3792_v8 = vcombine.low %v5148_v23, %v5170_v30  ;;  %v3821_v41 = vld [vmem:[%s5979_s1 + $0x10] sm:$0x3]  ;;  %v3820_v23 = vrot.slane %v5238_v48, 9  ;;  %v1449_v37 = vsel %vm5328_vm11, 0, %v1448_v9  ;;  %v4673_v14 = vld [vmem:[%s5981_s3 + $0x60] sm:$0xff]   ;;  %v5420_v19 = vld [vmem:[%s5981_s3 + $0xb8] sm:$0xff]  }
  0x5c   : > { %v1320_v58 = vsel %vm507_vm0, %v3821_v41, 0  ;;  %4393 = vmatprep.subr.bf16.mxu1 %v4667_v4  ;;  %1450 = vst [vmem:[#allocation2 + $0x40] sm:$0x1] %v1449_v37  ;;  %1418 = vst [vmem:[#allocation2] sm:$0xf] %v4810_v51 }
  0x5d   : > { %1419 = vst [vmem:[#allocation2 + $0x4] sm:$0x1] %v4810_v51  ;;  %1421 = vst [vmem:[#allocation2 + $0x48] sm:$0xf] %v4810_v51  ;;  %v1468_v40 = vld [vmem:[#allocation2 + $0x34] sm:$0x1] }
  0x5e   : > { %1422 = vst [vmem:[#allocation2 + $0x4c] sm:$0x1] %v4810_v51  ;;  %6007 = vst [vmem:[#allocation10_spill] sm:$0xff] %v5420_v19 }
  0x60   : > { %4360 = vmatmul.mubr.msk.bf16.gmra.mxu1 %vm494_vm3, %v3803_v16  ;;  %v4675_v16 = vld [vmem:[%s5981_s3 + $0x58] sm:$0xff]  }
  0x61   : > { %4330 = vmatmul.mubr.msk.bf16.gmra.mxu0 %vm494_vm3, %v3775_v31  ;;  %4375 = vmatprep.mubr.msk.bf16.mxu1 %vm494_vm3, %v5097_v2  ;;  %v3793_v2 = vcombine.low %v5180_v39, %v930_v42  ;;  %v4665_v39 = vld [vmem:[%s5981_s3 + $0x30] sm:$0xff]  }
  0x62   : > { %4345 = vmatprep.mubr.msk.bf16.mxu0 %vm494_vm3, %v3790_v17  ;;  %v4677_v17 = vld [vmem:[%s5981_s3 + $0x50] sm:$0xff]  }
  0x68   : > { %4376 = vmatmul.mubr.msk.bf16.vlgmr.msra.gmra.mxu1 %vm494_vm3, %v5154_v25  ;;  %v1310_v25 = vrot.slane %v5240_v5, 5  ;;  %v1463_v5 = vsel %vm5335_vm12, 0, %v1462_v56 }
  0x69   : > { %4346 = vmatmul.mubr.msk.bf16.vlgmr.msra.gmra.mxu0 %vm494_vm3, %v3791_v11  ;;  %4379 = vmatprep.mubr.msk.bf16.mxu1 %vm494_vm3, %v5190_v49  ;;  %v6001_v49 = vmov 0  ;;  %1464 = vst [vmem:[#allocation2 + $0x24] sm:$0x1] %v1463_v5  ;;  %v5408_v11 = vld [vmem:[%s5981_s3 + $0xf8] sm:$0xff]  }
  0x6a   : > { %4364 = vmatpush3.bf16.msra.mxu0 %v4954_v13  ;;  %4349 = vmatprep.mubr.msk.bf16.mxu0 %vm494_vm3, %v3792_v8  ;;  %v3809_v13 = vcombine.low %v5225_v32, %v5238_v48  ;;  %v6002_v49 = vsel %vm5328_vm11, 4294967295, %v6001_v49  ;;  %v1459_v32 = vld [vmem:[#allocation2 + $0x1c] sm:$0x1]  ;;  %v1437_v48 = vsel %vm5328_vm11, 0, %v1436_v44  ;;  %6006 = vst [vmem:[#allocation9_spill] sm:$0xff] %v5408_v11  ;;  %v4680_v8 = vld [vmem:[%s5981_s3 + $0x48] sm:$0xff]  }
  0x6b   : > { %4620 = vmatprep.subr.msk.bf16.mxu0 %vm507_vm0, %v3821_v41  ;;  %6003 = vst [vmem:[#allocation8_spill] sm:$0xff] %v6002_v49  ;;  %v1460_v43 = vsel %vm5335_vm12, 0, %v1459_v32  ;;  %1438 = vst [vmem:[#allocation2 + $0x20] sm:$0x1] %v1437_v48  ;;  %4394 = vmatpush3.bf16.msra.mxu1 %v4667_v4  ;;  %v4683_v41 = vld [vmem:[%s5981_s3 + $0x40] sm:$0xff]  }
  0x6c   : > { %1461 = vst [vmem:[#allocation2 + $0x1c] sm:$0x1] %v1460_v43  ;;  %4395 = vmatprep.subr.bf16.mxu1 %v4669_v35  ;;  %v5451_v49 = vld [vmem:[#allocation2] sm:$0xf] }
  0x6f   : > { %4396 = vmatpush3.bf16.msra.mxu1 %v4669_v35 }
  0x70   : > { %4380 = vmatmul.mubr.msk.bf16.gmra.mxu1 %vm494_vm3, %v3815_v54  ;;  %4397 = vmatprep.subr.bf16.mxu1 %v4671_v52 }
  0x71   : > { %4350 = vmatmul.mubr.msk.bf16.gmra.mxu0 %vm494_vm3, %v3793_v2 }
  0x72   : > { %4365 = vmatprep.mubr.msk.bf16.mxu0 %vm494_vm3, %v5220_v0  ;;  %v1433_v0 = vld [vmem:[#allocation2 + $0x18] sm:$0x1] }
  0x73   : > { %v1434_v7 = vsel %vm5328_vm11, 0, %v1433_v0  ;;  %4398 = vmatpush3.bf16.msra.mxu1 %v4671_v52 }
  0x74   : > { %1435 = vst [vmem:[#allocation2 + $0x18] sm:$0x1] %v1434_v7  ;;  %4399 = vmatprep.subr.bf16.mxu1 %v4673_v14 }
  0x77   : > { %4400 = vmatpush3.bf16.msra.mxu1 %v4673_v14 }
  0x78   : > { %4401 = vmatprep.subr.bf16.mxu1 %v4675_v16 }
  0x79   : > { %4366 = vmatmul.mubr.msk.bf16.vlgmr.msra.gmra.mxu0 %vm494_vm3, %v5111_v33  ;;  %v1311_v33 = vsel %vm5159_vm7, %v3820_v23, %v1310_v25 }
  0x7a   : > { %4384 = vmatpush3.bf16.msra.mxu0 %v1320_v58  ;;  %4369 = vmatprep.mubr.msk.bf16.mxu0 %vm494_vm3, %v5133_v50  ;;  %v3822_v30 = vcombine.low %v1030_v6, %v1311_v33  ;;  %v4664_v50 = vld [vmem:[%s5981_s3 + $0x38] sm:$0xff]   ;;  %v1469_v6 = vsel %vm5335_vm12, 0, %v1468_v40 }
  0x7b   : > { %4417 = vmatprep.subr.bf16.mxu0 %v4664_v50  ;;  %1470 = vst [vmem:[#allocation2 + $0x34] sm:$0x1] %v1469_v6  ;;  %4402 = vmatpush3.bf16.msra.mxu1 %v4675_v16 }
  0x7c   : > { %4403 = vmatprep.subr.bf16.mxu1 %v4677_v17 }
  0x7f   : > { %4404 = vmatpush3.bf16.msra.mxu1 %v4677_v17 }
  0x80   : > { %4405 = vmatprep.subr.bf16.mxu1 %v4680_v8 }
  0x81   : > { %4370 = vmatmul.mubr.msk.bf16.gmra.mxu0 %vm494_vm3, %v3809_v13 }
  0x82   : > { %4385 = vmatprep.mubr.msk.bf16.mxu0 %vm494_vm3, %v3773_v21  ;;  %v1475_v21 = vsel %vm5335_vm12, 0, %v1474_v10 }
  0x83   : > { %1476 = vst [vmem:[#allocation2 + $0x44] sm:$0x1] %v1475_v21  ;;  %4406 = vmatpush3.bf16.msra.mxu1 %v4680_v8 }
  0x84   : > { %4407 = vmatprep.subr.bf16.mxu1 %v4683_v41 }
  0x87   : > { %4408 = vmatpush3.bf16.msra.mxu1 %v4683_v41 }
  0x88   : > { %4441 = vmatprep.subr.bf16.mxu1 %v5420_v19 }
  0x89   : > { %4386 = vmatmul.mubr.msk.bf16.vlgmr.msra.gmra.mxu0 %vm494_vm3, %v3774_v61  ;;  %v1442_v61 = vld [vmem:[#allocation2 + $0x30] sm:$0x1] }
  0x8a   : > { %4389 = vmatprep.mubr.msk.bf16.mxu0 %vm494_vm3, %v3775_v31  ;;  %4418 = vmatpush3.bf16.msra.mxu0 %v4664_v50  ;;  %v1443_v59 = vsel %vm5328_vm11, 0, %v1442_v61  ;;  %v4676_v31 = vld [vmem:[%s5981_s3] sm:$0xff]  }
  0x8b   : > { %4419 = vmatprep.subr.bf16.mxu0 %v4665_v39  ;;  %1444 = vst [vmem:[#allocation2 + $0x30] sm:$0x1] %v1443_v59 }
  0x8e   : > { %4420 = vmatpush3.bf16.msra.mxu0 %v4665_v39 }
  0x8f   : > { %4421 = vmatprep.subr.bf16.mxu0 %v4666_v38 }
  0x91   : > { %4390 = vmatmul.mubr.msk.bf16.gmra.mxu0 %vm494_vm3, %v3822_v30 }
  0x92   : > { %4422 = vmatpush3.bf16.msra.mxu0 %v4666_v38 }
  0x93   : > { %4423 = vmatprep.subr.bf16.mxu0 %v4668_v53 }
  0x96   : > { %4424 = vmatpush3.bf16.msra.mxu0 %v4668_v53 }
  0x97   : > { %4425 = vmatprep.subr.bf16.mxu0 %v4670_v29 }
  0x9a   : > { %4426 = vmatpush3.bf16.msra.mxu0 %v4670_v29 }
  0x9b   : > { %4427 = vmatprep.subr.bf16.mxu0 %v4672_v18 }
  0x9e   : > { %4428 = vmatpush3.bf16.msra.mxu0 %v4672_v18 }
  0x9f   : > { %4429 = vmatprep.subr.bf16.mxu0 %v4674_v63 }
  0xa2   : > { %4430 = vmatpush3.bf16.msra.mxu0 %v4674_v63 }
  0xa3   : > { %4431 = vmatprep.subr.bf16.mxu0 %v4676_v31 }
  0xa6   : > { %4432 = vmatpush3.bf16.msra.mxu0 %v4676_v31 }
  0xa7   : > { %4465 = vmatprep.subr.bf16.mxu0 %v5408_v11 }
  0xfb   : > { %v4307_v42 = vpop.f32.mrf.mxu0 }
  0xfd   : > { %v545_v54 = vpop.f32.mrf.mxu0 }
  0xff   : > { %v4308_v58 = vpop.f32.mrf.mxu0 }
 0x100   : > { %v5423_v2 = vpop.f32.mrf.mxu1 }
 0x101   : > { %v548_v25 = vpop.f32.mrf.mxu0 }
 0x102   : > { %v5425_v13 = vpop.f32.mrf.mxu1 }
 0x104   : > { %v5427_v23 = vpop.f32.mrf.mxu1 }
 0x106   : > { %v5429_v33 = vpop.f32.mrf.mxu1 }
 0x108   : > { %v4337_v30 = vpop.f32.mrf.mxu1 }
 0x109   : > { %v4311_v50 = vpop.f32.mrf.mxu0 }
 0x10a   : > { %v878_v39 = vpop.f32.mrf.mxu1 }
 0x10b   : > { %v561_v0 = vpop.f32.mrf.mxu0 }
 0x10c   : > { %v4338_v32 = vpop.f32.mrf.mxu1 }
 0x10d   : > { %v4312_v7 = vpop.f32.mrf.mxu0 }
 0x10e   : > { %v881_v3 = vpop.f32.mrf.mxu1 }
 0x10f   : > { %v564_v38 = vpop.f32.mrf.mxu0 }
 0x110   : > { %v5431_v43 = vpop.f32.mrf.mxu1 }
 0x111   : > { %v4317_v24 = vpop.f32.mrf.mxu0 }
 0x112   : > { %v5433_v26 = vpop.f32.mrf.mxu1  ;;  %v654_v51 = vadd.f32 %v4317_v24, %v4307_v42  ;;  %v670_v42 = vadd.f32 %v5423_v2, %v4311_v50  ;;  %v1675_v2 = vshll.u32 %v5451_v49, 16 }
 0x113   : > { %v645_v12 = vpop.f32.mrf.mxu0 }
 0x114   : > { %v5435_v46 = vpop.f32.mrf.mxu1  ;;  %v646_v40 = vadd.f32 %v645_v12, %v545_v54  ;;  %v662_v54 = vadd.f32 %v5425_v13, %v561_v0 }
 0x115   : > { %v4318_v4 = vpop.f32.mrf.mxu0 }
 0x116   : > { %v5437_v44 = vpop.f32.mrf.mxu1  ;;  %v657_v16 = vadd.f32 %v4318_v4, %v4308_v58  ;;  %v665_v4 = vadd.f32 %v5429_v33, %v564_v38  ;;  %v1677_v38 = vrot.slane %v1675_v2, 5 }
 0x117   : > { %v648_v56 = vpop.f32.mrf.mxu0 }
 0x118   : > { %v4357_v48 = vpop.f32.mrf.mxu1  ;;  %v649_v17 = vadd.f32 %v648_v56, %v548_v25  ;;  %v1672_v25 = vshrl.u32 %v5451_v49, 16 }
 0x119   : > { %v4327_v5 = vpop.f32.mrf.mxu0 }
 0x11a   : > { %v1087_v53 = vpop.f32.mrf.mxu1  ;;  %v815_v59 = vadd.f32 %v4327_v5, %v654_v51 }
 0x11b   : > { %v782_v62 = vpop.f32.mrf.mxu0 }
 0x11c   : > { %v5439_v55 = vpop.f32.mrf.mxu1  ;;  %v813_v31 = vadd.f32 %v782_v62, %v646_v40  ;;  %v911_v41 = vadd.f32 %v4337_v30, %v815_v59  ;;  %v673_v30 = vadd.f32 %v5427_v23, %v4312_v7  ;;  %v1674_v7 = vrot.slane %v1672_v25, 4 }
 0x11d   : > { %v4328_v57 = vpop.f32.mrf.mxu0 }
 0x11e   : > { %v5441_v34 = vpop.f32.mrf.mxu1  ;;  %v816_v15 = vadd.f32 %v4328_v57, %v657_v16 }
 0x11f   : > { %v785_v27 = vpop.f32.mrf.mxu0 }
 0x120   : > { %v5443_v35 = vpop.f32.mrf.mxu1  ;;  %v814_v11 = vadd.f32 %v785_v27, %v649_v17  ;;  %v912_v12 = vadd.f32 %v4338_v32, %v816_v15 }
 0x121   : > { %v4331_v45 = vpop.f32.mrf.mxu0 }
 0x122   : > { %v5445_v20 = vpop.f32.mrf.mxu1  ;;  %v819_v56 = vadd.f32 %v4331_v45, %v670_v42  ;;  %v910_v62 = vadd.f32 %v881_v3, %v814_v11 }
 0x123   : > { %v798_v60 = vpop.f32.mrf.mxu0 }
 0x124   : > { %v5447_v29 = vpop.f32.mrf.mxu1  ;;  %v817_v27 = vadd.f32 %v798_v60, %v662_v54 }
 0x125   : > { %v4332_v1 = vpop.f32.mrf.mxu0  ;;  %6008 = vst [vmem:[#allocation11_spill] sm:$0xff] %v5447_v29 }
 0x126   : > { %v5449_v37 = vpop.f32.mrf.mxu1  ;;  %v820_v50 = vadd.f32 %v4332_v1, %v673_v30  ;;  %v913_v33 = vadd.f32 %v5433_v26, %v817_v27 }
 0x127   : > { %v801_v36 = vpop.f32.mrf.mxu0  ;;  %6009 = vst [vmem:[#allocation12_spill] sm:$0xff] %v5449_v37  ;;  %v909_v37 = vadd.f32 %v878_v39, %v813_v31 }
 0x128   : > { %v4377_v21 = vpop.f32.mrf.mxu1  ;;  %v818_v51 = vadd.f32 %v801_v36, %v665_v4 }
 0x129   : > { %v4347_v28 = vpop.f32.mrf.mxu0 }
 0x12a   : > { %v1268_v6 = vpop.f32.mrf.mxu1  ;;  %v1020_v29 = vadd.f32 %v4347_v28, %v911_v41  ;;  %v914_v45 = vadd.f32 %v5437_v44, %v818_v51  ;;  %v5470_v44 = vld [vmem:[#allocation2 + $0x4] sm:$0x1] }
 0x12b   : > { %v987_v22 = vpop.f32.mrf.mxu0 }
 0x12c   : > { %v4378_v19 = vpop.f32.mrf.mxu1  ;;  %v1018_v5 = vadd.f32 %v987_v22, %v909_v37  ;;  %v1120_v39 = vadd.f32 %v4357_v48, %v1020_v29  ;;  %v915_v37 = vadd.f32 %v5431_v43, %v819_v56  ;;  %v916_v48 = vadd.f32 %v5435_v46, %v820_v50  ;;  %v6010_v17 = vld [vmem:[#allocation11_spill] sm:$0xff] }
 0x12d   : > { %v4348_v52 = vpop.f32.mrf.mxu0 }
 0x12e   : > { %v1271_v58 = vpop.f32.mrf.mxu1  ;;  %v1021_v28 = vadd.f32 %v4348_v52, %v912_v12  ;;  %v1118_v0 = vadd.f32 %v1087_v53, %v1018_v5  ;;  %v6011_v41 = vld [vmem:[#allocation12_spill] sm:$0xff] }
 0x12f   : > { %v990_v9 = vpop.f32.mrf.mxu0 }
 0x130   : > { %v1019_v13 = vadd.f32 %v990_v9, %v910_v62  ;;  %v4381_v22 = vpop.f32.mrf.mxu1  ;;  %v1121_v11 = vadd.f32 %v5439_v55, %v1021_v28  ;;  %v5468_v55 = vld [vmem:[%s5980_s2] ss:$0 sm:$0xff] }
 0x131   : > { %v4351_v10 = vpop.f32.mrf.mxu0 }
 0x132   : > { %v1024_v60 = vadd.f32 %v4351_v10, %v915_v37  ;;  %v1119_v1 = vadd.f32 %v5441_v34, %v1019_v13  ;;  %v1284_v43 = vpop.f32.mrf.mxu1 }
 0x133   : > { %v1003_v18 = vpop.f32.mrf.mxu0 }
 0x134   : > { %v1022_v36 = vadd.f32 %v1003_v18, %v913_v33  ;;  %v1124_v34 = vadd.f32 %v5443_v35, %v1024_v60  ;;  %v1678_v18 = vor.u32 %v1677_v38, %v1674_v7 }
 0x135   : > { %v4352_v14 = vpop.f32.mrf.mxu0 }
 0x136   : > { %v1025_v9 = vadd.f32 %v4352_v14, %v916_v48  ;;  %v1603_v48 = vld [vmem:[#allocation2 + $0x18] sm:$0xf] }
 0x137   : > { %v1006_v61 = vpop.f32.mrf.mxu0 }
 0x138   : > { %v1023_v40 = vadd.f32 %v1006_v61, %v914_v45  ;;  %v4382_v61 = vpop.f32.mrf.mxu1  ;;  %v1606_v45 = vld [vmem:[#allocation2 + $0x1c] sm:$0x1] }
 0x139   : > { %v4367_v63 = vpop.f32.mrf.mxu0 }
 0x13a   : > { %v1204_v32 = vadd.f32 %v4367_v63, %v1120_v39 }
 0x13b   : > { %v1171_v8 = vpop.f32.mrf.mxu0 }
 0x13c   : > { %v1202_v3 = vadd.f32 %v1171_v8, %v1118_v0  ;;  %v1301_v29 = vadd.f32 %v4377_v21, %v1204_v32  ;;  %v1122_v21 = vadd.f32 %v5445_v20, %v1022_v36  ;;  %v1125_v8 = vadd.f32 %v6010_v17, %v1025_v9 }
 0x13d   : > { %v4368_v47 = vpop.f32.mrf.mxu0 }
 0x13e   : > { %v1205_v52 = vadd.f32 %v4368_v47, %v1121_v11  ;;  %v1299_v46 = vadd.f32 %v1268_v6, %v1202_v3  ;;  %v1681_v47 = vshll.u32 %v5470_v44, 16  ;;  %v1123_v6 = vadd.f32 %v6011_v41, %v1023_v40 }
 0x13f   : > { %v1174_v24 = vpop.f32.mrf.mxu0 }
 0x140   : > { %v1203_v59 = vadd.f32 %v1174_v24, %v1119_v1  ;;  %v1302_v14 = vadd.f32 %v4378_v19, %v1205_v52  ;;  %v1287_v19 = vpop.f32.mrf.mxu1 }
 0x141   : > { %v4371_v57 = vpop.f32.mrf.mxu0 }
 0x142   : > { %v1208_v42 = vadd.f32 %v4371_v57, %v1124_v34  ;;  %v1300_v24 = vadd.f32 %v1271_v58, %v1203_v59  ;;  %v5480_v57 = vrot.slane %v1678_v18, 4  ;;  %v5482_v58 = vrot.slane %v1681_v47, 5  ;;  %v1591_v59 = vld [vmem:[#allocation2 + $0x8] sm:$0xf] }
 0x143   : > { %v1187_v15 = vpop.f32.mrf.mxu0 }
 0x144   : > { %v1206_v12 = vadd.f32 %v1187_v15, %v1122_v21  ;;  %v1305_v28 = vadd.f32 %v4381_v22, %v1208_v42 }
 0x145   : > { %v4372_v23 = vpop.f32.mrf.mxu0 }
 0x146   : > { %v1209_v30 = vadd.f32 %v4372_v23, %v1125_v8  ;;  %v1303_v50 = vadd.f32 %v1284_v43, %v1206_v12 }
 0x147   : > { %v1190_v53 = vpop.f32.mrf.mxu0 }
 0x148   : > { %v1207_v4 = vadd.f32 %v1190_v53, %v1123_v6  ;;  %v1306_v0 = vadd.f32 %v4382_v61, %v1209_v30 }
 0x149   : > { %v4387_v26 = vpop.f32.mrf.mxu0 }
 0x14a   : > { %v1389_v63 = vadd.f32 %v4387_v26, %v1301_v29  ;;  %v1304_v32 = vadd.f32 %v1287_v19, %v1207_v4  ;;  %v1594_v26 = vld [vmem:[#allocation2 + $0xc] sm:$0x1]  ;;  %v1600_v19 = vld [vmem:[#allocation2 + $0x14] sm:$0x1] }
 0x14b   : > { %v1356_v10 = vpop.f32.mrf.mxu0 }
 0x14c   : > { %v1404_v16 = vadd.f32 %v5468_v55, %v1389_v63  ;;  %v1387_v31 = vadd.f32 %v1356_v10, %v1299_v46 }
 0x14d   : > { %v4388_v54 = vpop.f32.mrf.mxu0 }
 0x14e   : > { %v1412_v35 = vmax.f32 %v1404_v16, 0.0  ;;  %v1402_v5 = vadd.f32 %v5468_v55, %v1387_v31  ;;  %v1390_v25 = vadd.f32 %v4388_v54, %v1302_v14  ;;  %v1612_v54 = vld [vmem:[#allocation2 + $0x24] sm:$0x1] }
 0x14f   : > { %v1359_v20 = vpop.f32.mrf.mxu0 }
 0x150   : > { %v4112_v56 = vpack.c.bf16 %v1412_v35, %v1412_v35  ;;  %v1410_v62 = vmax.f32 %v1402_v5, 0.0  ;;  %v1405_v27 = vadd.f32 %v5468_v55, %v1390_v25  ;;  %v1388_v39 = vadd.f32 %v1359_v20, %v1300_v24  ;;  %v1609_v24 = vld [vmem:[#allocation2 + $0x20] sm:$0xf]  ;;  %v1597_v20 = vld [vmem:[#allocation2 + $0x10] sm:$0xf] }
 0x151   : > { %v4391_v2 = vpop.f32.mrf.mxu0 }
 0x152   : > { %v1526_v51 = vshrl.u32 %v4112_v56, 16  ;;  %v4110_v13 = vpack.c.bf16 %v1410_v62, %v1410_v62  ;;  %v1413_v15 = vmax.f32 %v1405_v27, 0.0  ;;  %v1403_v37 = vadd.f32 %v5468_v55, %v1388_v39 }
 0x153   : > { %v1393_v23 = vadd.f32 %v4391_v2, %v1305_v28  ;;  %v1372_v7 = vpop.f32.mrf.mxu0  ;;  %v1529_v11 = vshll.u32 %v4112_v56, 16  ;;  %v1684_v28 = vsel %vm5034_vm4, %v5480_v57, %v5482_v58 }
 0x154   : > { %v1528_v33 = vrot.slane %v1526_v51, 7  ;;  %v1510_v3 = vshrl.u32 %v4110_v13, 16  ;;  %v4113_v22 = vpack.c.bf16 %v1413_v15, %v1413_v15  ;;  %v1513_v60 = vshll.u32 %v4110_v13, 16  ;;  %v1627_v15 = vld [vmem:[#allocation2 + $0x38] sm:$0xf] }
 0x155   : > { %v1411_v1 = vmax.f32 %v1403_v37, 0.0  ;;  %v1408_v53 = vadd.f32 %v5468_v55, %v1393_v23  ;;  %v1391_v36 = vadd.f32 %v1372_v7, %v1303_v50  ;;  %v4392_v29 = vpop.f32.mrf.mxu0  ;;  %v1630_v23 = vld [vmem:[#allocation2 + $0x3c] sm:$0x1] }
 0x156   : > { %v1531_v52 = vor.u32 %v1529_v11, %v1528_v33  ;;  %v1532_v43 = vrot.slane %v1528_v33, 4  ;;  %v1512_v9 = vrot.slane %v1510_v3, 7  ;;  %v1534_v40 = vshrl.u32 %v4113_v22, 16 }
 0x157   : > { %v1537_v46 = vshll.u32 %v4113_v22, 16  ;;  %v4111_v63 = vpack.c.bf16 %v1411_v1, %v1411_v1  ;;  %v1416_v34 = vmax.f32 %v1408_v53, 0.0  ;;  %v1406_v10 = vadd.f32 %v5468_v55, %v1391_v36  ;;  %v1375_v41 = vpop.f32.mrf.mxu0  ;;  %v1615_v22 = vld [vmem:[#allocation2 + $0x28] sm:$0xf] }
 0x158   : > { %v1604_v18 = vsel %vm5487_vm14, %v1531_v52, %v1603_v48  ;;  %v1607_v21 = vsel %vm5328_vm11, %v1532_v43, %v1606_v45  ;;  %v1515_v14 = vor.u32 %v1513_v60, %v1512_v9  ;;  %v1516_v61 = vrot.slane %v1512_v9, 4  ;;  %v1618_v48 = vld [vmem:[#allocation2 + $0x2c] sm:$0x1] }
 0x159   : > { %1605 = vst [vmem:[#allocation2 + $0x18] sm:$0xf] %v1604_v18  ;;  %1608 = vst [vmem:[#allocation2 + $0x1c] sm:$0x1] %v1607_v21  ;;  %v1536_v16 = vrot.slane %v1534_v40, 7  ;;  %v1518_v31 = vshrl.u32 %v4111_v63, 16  ;;  %v4116_v8 = vpack.c.bf16 %v1416_v34, %v1416_v34  ;;  %v1394_v35 = vadd.f32 %v4392_v29, %v1306_v0 }
 0x15a   : > { %v1521_v17 = vshll.u32 %v4111_v63, 16  ;;  %v1592_v6 = vsel %vm5487_vm14, %v1515_v14, %v1591_v59  ;;  %v1595_v42 = vsel %vm5328_vm11, %v1516_v61, %v1594_v26  ;;  %v1414_v12 = vmax.f32 %v1406_v10, 0.0 }
 0x15b   : > { %1593 = vst [vmem:[#allocation2 + $0x8] sm:$0xf] %v1592_v6  ;;  %1596 = vst [vmem:[#allocation2 + $0xc] sm:$0x1] %v1595_v42  ;;  %v1539_v5 = vor.u32 %v1537_v46, %v1536_v16  ;;  %v1540_v25 = vrot.slane %v1536_v16, 4  ;;  %v1520_v30 = vrot.slane %v1518_v31, 7  ;;  %v1409_v62 = vadd.f32 %v5468_v55, %v1394_v35 }
 0x15c   : > { %v1558_v4 = vshrl.u32 %v4116_v8, 16  ;;  %v4114_v56 = vpack.c.bf16 %v1414_v12, %v1414_v12  ;;  %v1392_v27 = vadd.f32 %v1375_v41, %v1304_v32  ;;  %v1561_v37 = vshll.u32 %v4116_v8, 16  ;;  %v1633_v31 = vld [vmem:[#allocation2 + $0x40] sm:$0xf]  ;;  %v1621_v35 = vld [vmem:[#allocation2 + $0x30] sm:$0xf] }
 0x15d   : > { %v1610_v2 = vsel %vm5487_vm14, %v1539_v5, %v1609_v24  ;;  %v1613_v50 = vsel %vm5328_vm11, %v1540_v25, %v1612_v54  ;;  %v1523_v51 = vor.u32 %v1521_v17, %v1520_v30  ;;  %v1524_v13 = vrot.slane %v1520_v30, 4  ;;  %v1636_v17 = vld [vmem:[#allocation2 + $0x44] sm:$0x1]  ;;  %v1624_v5 = vld [vmem:[#allocation2 + $0x34] sm:$0x1] }
 0x15e   : > { %1611 = vst [vmem:[#allocation2 + $0x20] sm:$0xf] %v1610_v2  ;;  %1614 = vst [vmem:[#allocation2 + $0x24] sm:$0x1] %v1613_v50  ;;  %v1560_v0 = vrot.slane %v1558_v4, 7  ;;  %v1542_v32 = vshrl.u32 %v4114_v56, 16  ;;  %v1407_v45 = vadd.f32 %v5468_v55, %v1392_v27 }
 0x15f   : > { %v1417_v7 = vmax.f32 %v1409_v62, 0.0  ;;  %v1598_v33 = vsel %vm5487_vm14, %v1523_v51, %v1597_v20  ;;  %v1601_v11 = vsel %vm5328_vm11, %v1524_v13, %v1600_v19  ;;  %v1545_v3 = vshll.u32 %v4114_v56, 16  ;;  %v4682_v13 = vld [vmem:[%s5981_s3 + $0xf0] sm:$0xff]  }
 0x160   : > { %1599 = vst [vmem:[#allocation2 + $0x10] sm:$0xf] %v1598_v33  ;;  %1602 = vst [vmem:[#allocation2 + $0x14] sm:$0x1] %v1601_v11  ;;  %v1563_v60 = vor.u32 %v1561_v37, %v1560_v0  ;;  %v1564_v1 = vrot.slane %v1560_v0, 4  ;;  %v1544_v53 = vrot.slane %v1542_v32, 7 }
 0x161   : > { %v4117_v36 = vpack.c.bf16 %v1417_v7, %v1417_v7  ;;  %v1642_v29 = vld [vmem:[#allocation2 + $0x18] sm:$0xf]  ;;  %v5515_v52 = vld [vmem:[#allocation2 + $0x1c] sm:$0x1]  ;;  %v1415_v43 = vmax.f32 %v1407_v45, 0.0 }
 0x162   : > { %v1714_v9 = vshrl.u32 %v1642_v29, 16  ;;  %v1717_v40 = vshll.u32 %v1642_v29, 16  ;;  %v1723_v59 = vshll.u32 %v5515_v52, 16  ;;  %v1628_v26 = vsel %vm5487_vm14, %v1563_v60, %v1627_v15  ;;  %v1640_v34 = vld [vmem:[#allocation2 + $0x8] sm:$0xf] }
 0x163   : > { %v1631_v55 = vsel %vm5328_vm11, %v1564_v1, %v1630_v23  ;;  %v1547_v46 = vor.u32 %v1545_v3, %v1544_v53  ;;  %v1548_v63 = vrot.slane %v1544_v53, 4  ;;  %1629 = vst [vmem:[#allocation2 + $0x38] sm:$0xf] %v1628_v26  ;;  %v1566_v10 = vshrl.u32 %v4117_v36, 16  ;;  %v5532_v0 = vld [vmem:[#allocation2 + $0xc] sm:$0x1] }
 0x164   : > { %1632 = vst [vmem:[#allocation2 + $0x3c] sm:$0x1] %v1631_v55  ;;  %v1569_v18 = vshll.u32 %v4117_v36, 16  ;;  %v4115_v21 = vpack.c.bf16 %v1415_v43, %v1415_v43  ;;  %v1686_v14 = vshrl.u32 %v1640_v34, 16  ;;  %v1689_v8 = vshll.u32 %v1640_v34, 16  ;;  %v6016_v53 = vld [vmem:[#allocation9_spill] sm:$0xff] }
 0x165   : > { %v1616_v61 = vsel %vm5487_vm14, %v1547_v46, %v1615_v22  ;;  %v1619_v16 = vsel %vm5328_vm11, %v1548_v63, %v1618_v48  ;;  %v3864_v41 = vcombine.low %v5451_v49, %v1640_v34  ;;  %v1568_v6 = vrot.slane %v1566_v10, 7  ;;  %v1643_v12 = vld [vmem:[#allocation2 + $0x20] sm:$0xf]  ;;  %v5554_v10 = vld [vmem:[#allocation2 + $0x24] sm:$0x1] }
 0x166   : > { %1617 = vst [vmem:[#allocation2 + $0x28] sm:$0xf] %v1616_v61  ;;  %1620 = vst [vmem:[#allocation2 + $0x2c] sm:$0x1] %v1619_v16  ;;  %v1550_v42 = vshrl.u32 %v4115_v21, 16  ;;  %v1553_v24 = vshll.u32 %v4115_v21, 16 }
 0x167   : > { %v1688_v54 = vrot.slane %v1686_v14, 4  ;;  %v1691_v25 = vrot.slane %v1689_v8, 5  ;;  %4433 = vmatprep.mubr.bf16.mxu0 %v3864_v41  ;;  %v5527_v30 = vrot.slane %v1714_v9, 4  ;;  %v1719_v4 = vrot.slane %v1717_v40, 5  ;;  %v1641_v27 = vld [vmem:[#allocation2 + $0x10] sm:$0xf] }
 0x168   : > { %v1728_v20 = vshrl.u32 %v1643_v12, 16  ;;  %v1571_v19 = vor.u32 %v1569_v18, %v1568_v6  ;;  %v1572_v56 = vrot.slane %v1568_v6, 4  ;;  %v1552_v62 = vrot.slane %v1550_v42, 7  ;;  %v5538_v33 = vld [vmem:[#allocation2 + $0x14] sm:$0x1]  ;;  %v4685_v40 = vld [vmem:[%s5981_s3 + $0xe8] sm:$0xff]  }
 0x169   : > { %v1731_v49 = vshll.u32 %v1643_v12, 16  ;;  %v1700_v2 = vshrl.u32 %v1641_v27, 16  ;;  %v1703_v50 = vshll.u32 %v1641_v27, 16  ;;  %v3865_v51 = vcombine.low %v1641_v27, %v1642_v29 }
 0x16a   : > { %v1730_v15 = vrot.slane %v1728_v20, 4  ;;  %v1634_v37 = vsel %vm5487_vm14, %v1571_v19, %v1633_v31  ;;  %v1637_v23 = vsel %vm5328_vm11, %v1572_v56, %v1636_v17  ;;  %v1555_v32 = vor.u32 %v1553_v24, %v1552_v62  ;;  %v5540_v45 = vld [vmem:[#allocation2 + $0x38] sm:$0xf]  ;;  %v2067_v20 = vld [vmem:[#allocation2 + $0x8] sm:$0xe]  ;;  %v4690_v56 = vld [vmem:[%s5981_s3 + $0xb0] sm:$0xff]  }
 0x16b   : > { %v1556_v7 = vrot.slane %v1552_v62, 4  ;;  %1635 = vst [vmem:[#allocation2 + $0x40] sm:$0xf] %v1634_v37  ;;  %1638 = vst [vmem:[#allocation2 + $0x44] sm:$0x1] %v1637_v23  ;;  %v1702_v11 = vrot.slane %v1700_v2, 4  ;;  %4434 = vmatmul.mubr.bf16.vlgmr.msra.gmra.mxu0 %v3865_v51  ;;  %v1692_v48 = vor.u32 %v1691_v25, %v1688_v54  ;;  %v1720_v41 = vor.u32 %v1719_v4, %v5527_v30 }
 0x16c   : > { %v1705_v3 = vrot.slane %v1703_v50, 5  ;;  %v1733_v22 = vrot.slane %v1731_v49, 5  ;;  %v1622_v60 = vsel %vm5487_vm14, %v1555_v32, %v1621_v35  ;;  %4466 = vmatpush3.bf16.msra.mxu0 %v6016_v53  ;;  %v1695_v36 = vshll.u32 %v5532_v0, 16  ;;  %v4689_v54 = vld [vmem:[%s5981_s3 + $0xe0] sm:$0xff]   ;;  %v5575_v58 = vld [vmem:[#allocation2 + $0x3c] sm:$0x1] }
 0x16d   : > { %v1625_v1 = vsel %vm5328_vm11, %v1556_v7, %v1624_v5  ;;  %v1770_v29 = vshrl.u32 %v5540_v45, 16  ;;  %1623 = vst [vmem:[#allocation2 + $0x30] sm:$0xf] %v1622_v60  ;;  %4467 = vmatprep.subr.bf16.mxu0 %v4682_v13  ;;  %v1644_v43 = vld [vmem:[#allocation2 + $0x28] sm:$0xf]  ;;  %v1693_v9 = vrot.slane %v1692_v48, 4 }
 0x16e   : > { %1626 = vst [vmem:[#allocation2 + $0x34] sm:$0x1] %v1625_v1  ;;  %v1773_v38 = vshll.u32 %v5540_v45, 16  ;;  %v1706_v26 = vor.u32 %v1705_v3, %v1702_v11  ;;  %v1709_v47 = vshll.u32 %v5538_v33, 16  ;;  %v1742_v55 = vshrl.u32 %v1644_v43, 16  ;;  %v4691_v7 = vld [vmem:[%s5981_s3 + $0xd8] sm:$0xff]  }
 0x16f   : > { %v1745_v46 = vshll.u32 %v1644_v43, 16  ;;  %v3866_v63 = vcombine.low %v1643_v12, %v1644_v43  ;;  %v1697_v34 = vrot.slane %v1695_v36, 5  ;;  %v1772_v18 = vrot.slane %v1770_v29, 4  ;;  %v5556_v16 = vld [vmem:[#allocation2 + $0x2c] sm:$0x1]  ;;  %v6017_v60 = vld [vmem:[#allocation10_spill] sm:$0xff] }
 0x170   : > { %v1775_v21 = vrot.slane %v1773_v38, 5  ;;  %v1707_v14 = vrot.slane %v1706_v26, 4  ;;  %v1711_v61 = vrot.slane %v1709_v47, 5  ;;  %v1744_v31 = vrot.slane %v1742_v55, 4  ;;  %4468 = vmatpush3.bf16.msra.mxu0 %v4682_v13  ;;  %v2066_v4 = vld [vmem:[#allocation2] sm:$0xe] }
 0x171   : > { %v1747_v17 = vrot.slane %v1745_v46, 5  ;;  %4437 = vmatprep.mubr.bf16.mxu0 %v3866_v63  ;;  %v1698_v8 = vsel %vm5034_vm4, %v1693_v9, %v1697_v34  ;;  %4469 = vmatprep.subr.bf16.mxu0 %v4685_v40  ;;  %v1725_v24 = vrot.slane %v1723_v59, 5  ;;  %v1734_v12 = vor.u32 %v1733_v22, %v1730_v15  ;;  %v4688_v37 = vld [vmem:[#allocation2 + $0x8] ss:$8 sps:$4 sm:$0xff]  }
 0x172   : > { %v3852_v6 = vcombine.low %v1684_v28, %v1698_v8  ;;  %v1712_v42 = vsel %vm5034_vm4, %v1707_v14, %v1711_v61  ;;  %v1721_v35 = vrot.slane %v1720_v41, 4  ;;  %v1737_v5 = vshll.u32 %v5554_v10, 16  ;;  %v4692_v43 = vld [vmem:[%s5981_s3 + $0xa8] sm:$0xff]   ;;  %v4693_v38 = vld [vmem:[%s5981_s3 + $0xd0] sm:$0xff]   ;;  %v4700_v41 = vld [vmem:[%s5981_s3 + $0x178] sm:$0xff]  }
 0x173   : > { %v1748_v25 = vor.u32 %v1747_v17, %v1744_v31  ;;  %v1751_v30 = vshll.u32 %v5556_v16, 16  ;;  %v1735_v57 = vrot.slane %v1734_v12, 4  ;;  %v1776_v28 = vor.u32 %v1775_v21, %v1772_v18  ;;  %v4694_v21 = vld [vmem:[%s5981_s3 + $0xa0] sm:$0xff]   ;;  %v4695_v61 = vld [vmem:[%s5981_s3 + $0xc8] sm:$0xff]   ;;  %v4696_v31 = vld [vmem:[%s5981_s3 + $0x98] sm:$0xff]  }
 0x174   : > { %4409 = vmatprep.mubr.bf16.mxu1 %v3852_v6  ;;  %v1645_v19 = vld [vmem:[#allocation2 + $0x30] sm:$0xf]  ;;  %4470 = vmatpush3.bf16.msra.mxu0 %v4685_v40  ;;  %v1726_v59 = vsel %vm5034_vm4, %v1721_v35, %v1725_v24  ;;  %v1739_v62 = vrot.slane %v1737_v5, 5  ;;  %v1779_v11 = vshll.u32 %v5575_v58, 16  ;;  %v3876_v1 = vrot.slane %v2066_v4, 9  ;;  %v4697_v17 = vld [vmem:[%s5981_s3 + $0xc0] sm:$0xff]  }
 0x175   : > { %v1749_v27 = vrot.slane %v1748_v25, 4  ;;  %v1753_v49 = vrot.slane %v1751_v30, 5  ;;  %v1756_v2 = vshrl.u32 %v1645_v19, 16  ;;  %v1759_v50 = vshll.u32 %v1645_v19, 16  ;;  %4471 = vmatprep.subr.bf16.mxu0 %v4689_v54  ;;  %v5583_v15 = vld [vmem:[#allocation2 + $0x34] sm:$0x1] }
 0x176   : > { %v3867_v51 = vcombine.low %v1645_v19, %v5540_v45  ;;  %v3853_v13 = vcombine.low %v1712_v42, %v1726_v59  ;;  %v1740_v23 = vsel %vm5034_vm4, %v1735_v57, %v1739_v62  ;;  %v1765_v45 = vshll.u32 %v5583_v15, 16  ;;  %v4698_v8 = vld [vmem:[%s5981_s3 + $0x90] sm:$0xff]   ;;  %v4701_v6 = vld [vmem:[%s5981_s3 + $0x88] sm:$0xff]   ;;  %v4699_v42 = vld [vmem:[#allocation2 + $0x18] ss:$8 sps:$4 sm:$0xff]  }
 0x177   : > { %v1754_v32 = vsel %vm5034_vm4, %v1749_v27, %v1753_v49  ;;  %v1758_v3 = vrot.slane %v1756_v2, 4  ;;  %v1761_v22 = vrot.slane %v1759_v50, 5  ;;  %v2092_v53 = vrot.slane %v5470_v44, 5  ;;  %v5632_v24 = vld [vmem:[#allocation2 + $0x14] sm:$0x1]  ;;  %v4704_v62 = vld [vmem:[%s5981_s3 + $0x80] sm:$0xff]  }
 0x178   : > { %4438 = vmatmul.mubr.bf16.gmra.mxu0 %v3867_v51  ;;  %4410 = vmatmul.mubr.bf16.vlgmr.msra.gmra.mxu1 %v3853_v13  ;;  %v3854_v48 = vcombine.low %v1740_v23, %v1754_v32  ;;  %v3877_v36 = vrot.slane %v2067_v20, 9  ;;  %v2096_v29 = vrot.slane %v5532_v0, 5  ;;  %v1777_v40 = vrot.slane %v1776_v28, 4  ;;  %v4703_v12 = vld [vmem:[%s5981_s3 + $0x170] sm:$0xff]   ;;  %v5637_v25 = vld [vmem:[#allocation2 + $0xc] sm:$0x1] }
 0x179   : > { %4442 = vmatpush3.bf16.msra.mxu1 %v6017_v60  ;;  %4481 = vmatprep.mubr.bf16.mxu0 %v4688_v37  ;;  %v1762_v9 = vor.u32 %v1761_v22, %v1758_v3  ;;  %v1767_v47 = vrot.slane %v1765_v45, 5  ;;  %v1781_v44 = vrot.slane %v1779_v11, 5  ;;  %v2093_v0 = vsel %vm5159_vm7, %v3876_v1, %v2092_v53  ;;  %v2729_v35 = vld [vmem:[#allocation2 + $0x10] sm:$0xe]  ;;  %v2446_v30 = vld [vmem:[#allocation2 + $0x8] sm:$0xf] }
 0x17a   : > { %4443 = vmatprep.subr.bf16.mxu1 %v4690_v56  ;;  %4472 = vmatpush3.bf16.msra.mxu0 %v4689_v54  ;;  %v2097_v46 = vsel %vm5159_vm7, %v3877_v36, %v2096_v29  ;;  %v2448_v54 = vld [vmem:[#allocation2 + $0x10] sm:$0xf]  ;;  %v2728_v28 = vld [vmem:[#allocation2 + $0x8] sm:$0xe]  ;;  %v3969_v19 = vrot.slane %v2729_v35, 9  ;;  %v2758_v59 = vrot.slane %v5632_v24, 5 }
 0x17b   : > { %4413 = vmatprep.mubr.bf16.mxu1 %v3854_v48  ;;  %4473 = vmatprep.subr.bf16.mxu0 %v4691_v7  ;;  %v1763_v26 = vrot.slane %v1762_v9, 4  ;;  %v1782_v34 = vsel %vm5034_vm4, %v1777_v40, %v1781_v44  ;;  %v3900_v14 = vcombine.low %v2093_v0, %v2097_v46  ;;  %v2068_v5 = vld [vmem:[#allocation2 + $0x10] sm:$0xe]  ;;  %v2477_v4 = vshrl.u32 %v2448_v54, 16  ;;  %v2069_v27 = vld [vmem:[#allocation2 + $0x18] sm:$0xe] }
 0x17c   : > { %v4702_v57 = vld [vmem:[#allocation2 + $0x28] ss:$8 sps:$4 sm:$0xff]   ;;  %v2480_v20 = vshll.u32 %v2448_v54, 16  ;;  %v2463_v49 = vshrl.u32 %v2446_v30, 16  ;;  %v2466_v2 = vshll.u32 %v2446_v30, 16  ;;  %v3878_v50 = vrot.slane %v2068_v5, 9 }
 0x17d   : > { %4444 = vmatpush3.bf16.msra.mxu1 %v4690_v56  ;;  %v1768_v63 = vsel %vm5034_vm4, %v1763_v26, %v1767_v47  ;;  %v2071_v56 = vld [vmem:[#allocation2 + $0x28] sm:$0xe]  ;;  %v2100_v51 = vrot.slane %v5538_v33, 5  ;;  %v3968_v13 = vrot.slane %v2728_v28, 9  ;;  %v2754_v37 = vrot.slane %v5637_v25, 5  ;;  %v4707_v60 = vld [vmem:[%s5981_s3 + $0x138] sm:$0xff]  }
 0x17e   : > { %4445 = vmatprep.subr.bf16.mxu1 %v4692_v43  ;;  %4474 = vmatpush3.bf16.msra.mxu0 %v4691_v7  ;;  %v3855_v18 = vcombine.low %v1768_v63, %v1782_v34  ;;  %v2070_v23 = vld [vmem:[#allocation2 + $0x20] sm:$0xe]  ;;  %v4706_v32 = vld [vmem:[%s5981_s3 + $0x168] sm:$0xff]   ;;  %v3881_v7 = vrot.slane %v2071_v56, 9  ;;  %v2112_v11 = vrot.slane %v5556_v16, 5  ;;  %v2479_v3 = vrot.slane %v2477_v4, 4 }
 0x17f   : > { %4475 = vmatprep.subr.bf16.mxu0 %v4693_v38  ;;  %v2482_v22 = vrot.slane %v2480_v20, 5  ;;  %v3879_v48 = vrot.slane %v2069_v27, 9  ;;  %v2104_v45 = vrot.slane %v5515_v52, 5  ;;  %v2759_v33 = vsel %vm5159_vm7, %v3969_v19, %v2758_v59  ;;  %v4705_v16 = vld [vmem:[#allocation2 + $0x38] ss:$8 sps:$4 sm:$0xff]   ;;  %v4709_v46 = vld [vmem:[%s5981_s3 + $0x130] sm:$0xff]  }
 0x180   : > { %4414 = vmatmul.mubr.bf16.gmra.mxu1 %v3855_v18  ;;  %v3880_v1 = vrot.slane %v2070_v23, 9  ;;  %v2108_v53 = vrot.slane %v5554_v10, 5  ;;  %v2465_v36 = vrot.slane %v2463_v49, 4  ;;  %v2468_v29 = vrot.slane %v2466_v2, 5  ;;  %v2072_v10 = vld [vmem:[#allocation2 + $0x30] sm:$0xe] }
 0x181   : > { %4446 = vmatpush3.bf16.msra.mxu1 %v4692_v43  ;;  %4457 = vmatprep.mubr.bf16.mxu1 %v3900_v14  ;;  %v2101_v43 = vsel %vm5159_vm7, %v3878_v50, %v2100_v51  ;;  %v2755_v52 = vsel %vm5159_vm7, %v3968_v13, %v2754_v37  ;;  %v2113_v40 = vsel %vm5159_vm7, %v3881_v7, %v2112_v11  ;;  %v2073_v63 = vld [vmem:[#allocation2 + $0x38] sm:$0xe]  ;;  %v2486_v18 = vshll.u32 %v5632_v24, 16  ;;  %v5691_v30 = vld [vmem:[#allocation2 + $0x24] sm:$0x1]  ;;  %v4714_v23 = vld [vmem:[%s5981_s3 + $0x148] sm:$0xff]  }
 0x182   : > { %4447 = vmatprep.subr.bf16.mxu1 %v4694_v21  ;;  %4476 = vmatpush3.bf16.msra.mxu0 %v4693_v38  ;;  %v3992_v9 = vcombine.low %v2755_v52, %v2759_v33  ;;  %v4708_v38 = vld [vmem:[%s5981_s3 + $0x160] sm:$0xff]   ;;  %v2483_v26 = vor.u32 %v2482_v22, %v2479_v3  ;;  %v2105_v47 = vsel %vm5159_vm7, %v3879_v48, %v2104_v45  ;;  %v3882_v14 = vrot.slane %v2072_v10, 9  ;;  %v2730_v35 = vld [vmem:[#allocation2 + $0x18] sm:$0xe]  ;;  %v5695_v4 = vld [vmem:[#allocation2 + $0x2c] sm:$0x1] }
 0x183   : > { %4477 = vmatprep.subr.bf16.mxu0 %v4695_v61  ;;  %v3901_v44 = vcombine.low %v2101_v43, %v2105_v47  ;;  %v2109_v0 = vsel %vm5159_vm7, %v3880_v1, %v2108_v53  ;;  %v2469_v34 = vor.u32 %v2468_v29, %v2465_v36  ;;  %v2488_v24 = vrot.slane %v2486_v18, 5  ;;  %v2732_v20 = vld [vmem:[#allocation2 + $0x28] sm:$0xe]  ;;  %v4713_v56 = vld [vmem:[%s5981_s3 + $0x120] sm:$0xff]   ;;  %v5702_v27 = vld [vmem:[#allocation2 + $0x34] sm:$0x1] }
 0x184   : > { %v2733_v49 = vld [vmem:[#allocation2 + $0x30] sm:$0xe]  ;;  %v2766_v13 = vrot.slane %v5691_v30, 5  ;;  %v2770_v7 = vrot.slane %v5695_v4, 5  ;;  %v2452_v11 = vld [vmem:[#allocation2 + $0x20] sm:$0xf] }
 0x185   : > { %4448 = vmatpush3.bf16.msra.mxu1 %v4694_v21  ;;  %v3902_v21 = vcombine.low %v2109_v0, %v2113_v40  ;;  %v3109_v37 = vld [vmem:[#allocation2 + $0x10] sm:$0xf]  ;;  %v3973_v3 = vrot.slane %v2733_v49, 9  ;;  %v2774_v22 = vrot.slane %v5702_v27, 5  ;;  %v3111_v48 = vld [vmem:[#allocation2 + $0x18] sm:$0xf] }
 0x186   : > { %4449 = vmatprep.subr.bf16.mxu1 %v4696_v31  ;;  %4478 = vmatpush3.bf16.msra.mxu0 %v4695_v61  ;;  %v2116_v61 = vrot.slane %v5583_v15, 5  ;;  %v2470_v15 = vrot.slane %v2469_v34, 4  ;;  %v2456_v45 = vld [vmem:[#allocation2 + $0x30] sm:$0xf]  ;;  %v4715_v33 = vld [vmem:[%s5981_s3 + $0x118] sm:$0xff]   ;;  %v3126_v53 = vshrl.u32 %v3109_v37, 16 }
 0x187   : > { %4479 = vmatprep.subr.bf16.mxu0 %v4697_v17  ;;  %v2450_v1 = vld [vmem:[#allocation2 + $0x18] sm:$0xf]  ;;  %v3129_v36 = vshll.u32 %v3109_v37, 16  ;;  %v5725_v43 = vld [vmem:[#allocation2 + $0x44] sm:$0x1]  ;;  %v2505_v52 = vshrl.u32 %v2452_v11, 16 }
 0x188   : > { %v2117_v54 = vsel %vm5159_vm7, %v3882_v14, %v2116_v61  ;;  %v2454_v40 = vld [vmem:[#allocation2 + $0x28] sm:$0xf]  ;;  %v3140_v10 = vshrl.u32 %v3111_v48, 16  ;;  %v2533_v47 = vshrl.u32 %v2456_v45, 16  ;;  %v4717_v0 = vld [vmem:[%s5981_s3 + $0x110] sm:$0xff]   ;;  %v2491_v34 = vshrl.u32 %v2450_v1, 16 }
 0x189   : > { %4450 = vmatpush3.bf16.msra.mxu1 %v4696_v31  ;;  %v4710_v31 = vld [vmem:[%s5981_s3 + $0x158] sm:$0xff]   ;;  %v2494_v18 = vshll.u32 %v2450_v1, 16  ;;  %v3128_v61 = vrot.slane %v3126_v53, 4 }
 0x18a   : > { %4451 = vmatprep.subr.bf16.mxu1 %v4698_v8  ;;  %4480 = vmatpush3.bf16.msra.mxu0 %v4697_v17  ;;  %v2472_v17 = vshll.u32 %v5637_v25, 16  ;;  %v5737_v14 = vld [vmem:[#allocation2 + $0x38] sm:$0xe] }
 0x18b   : > { %4513 = vmatprep.subr.bf16.mxu0 %v4700_v41 }
 0x18c   : > { %v2474_v5 = vrot.slane %v2472_v17, 5  ;;  %v2519_v17 = vshrl.u32 %v2454_v40, 16 }
 0x18d   : > { %4452 = vmatpush3.bf16.msra.mxu1 %v4698_v8  ;;  %4482 = vmatmul.mubr.bf16.vlgmr.msra.gmra.mxu0 %v4699_v42  ;;  %v2484_v8 = vrot.slane %v2483_v26, 4  ;;  %v4711_v42 = vld [vmem:[%s5981_s3 + $0x128] sm:$0xff]   ;;  %v3143_v26 = vshll.u32 %v3111_v48, 16 }
 0x18e   : > { %4453 = vmatprep.subr.bf16.mxu1 %v4701_v6  ;;  %4485 = vmatprep.mubr.bf16.mxu0 %v4702_v57  ;;  %v2731_v57 = vld [vmem:[#allocation2 + $0x20] sm:$0xe]  ;;  %v2475_v59 = vsel %vm5034_vm4, %v2470_v15, %v2474_v5  ;;  %v2507_v15 = vrot.slane %v2505_v52, 4  ;;  %v2535_v5 = vrot.slane %v2533_v47, 4 }
 0x18f   : > { %4514 = vmatpush3.bf16.msra.mxu0 %v4700_v41  ;;  %v3883_v41 = vrot.slane %v2073_v63, 9  ;;  %v2489_v25 = vsel %vm5034_vm4, %v2484_v8, %v2488_v24  ;;  %v3971_v51 = vrot.slane %v2731_v57, 9  ;;  %v2775_v63 = vsel %vm5159_vm7, %v3973_v3, %v2774_v22 }
 0x190   : > { %4515 = vmatprep.subr.bf16.mxu0 %v4703_v12  ;;  %v3956_v2 = vcombine.low %v2475_v59, %v2489_v25  ;;  %v2522_v8 = vshll.u32 %v2454_v40, 16  ;;  %v5745_v59 = vld [vmem:[#allocation2 + $0x14] sm:$0x1] }
 0x191   : > { %4454 = vmatpush3.bf16.msra.mxu1 %v4701_v6  ;;  %v2120_v6 = vrot.slane %v5575_v58, 5  ;;  %v4712_v58 = vld [vmem:[%s5981_s3 + $0x150] sm:$0xff]   ;;  %v3135_v22 = vshll.u32 %v5745_v59, 16 }
 0x192   : > { %4455 = vmatprep.subr.bf16.mxu1 %v4704_v62 }
 0x193   : > { %4516 = vmatpush3.bf16.msra.mxu0 %v4703_v12  ;;  %v5684_v12 = vld [vmem:[#allocation2 + $0x1c] sm:$0x1]  ;;  %v2121_v28 = vsel %vm5159_vm7, %v3883_v41, %v2120_v6  ;;  %v3137_v47 = vrot.slane %v3135_v22, 5 }
 0x194   : > { %4517 = vmatprep.subr.bf16.mxu0 %v4706_v32  ;;  %v3903_v19 = vcombine.low %v2117_v54, %v2121_v28  ;;  %v2762_v50 = vrot.slane %v5684_v12, 5  ;;  %v5739_v41 = vld [vmem:[#allocation2 + $0x3c] sm:$0x1]  ;;  %v3142_v54 = vrot.slane %v3140_v10, 4  ;;  %v3974_v28 = vrot.slane %v5737_v14, 9 }
 0x195   : > { %4456 = vmatpush3.bf16.msra.mxu1 %v4704_v62  ;;  %4486 = vmatmul.mubr.bf16.gmra.mxu0 %v4705_v16  ;;  %v3970_v62 = vrot.slane %v2730_v35, 9  ;;  %v5723_v16 = vsel %vm5159_vm7, %v3971_v51, %v2766_v13  ;;  %v3145_v35 = vrot.slane %v3143_v26, 5  ;;  %v2458_v51 = vld [vmem:[#allocation2 + $0x38] sm:$0xf]  ;;  %v2500_v40 = vshll.u32 %v5684_v12, 16  ;;  %v4722_v26 = vld [vmem:[%s5981_s3 + $0x1e8] sm:$0xff]  }
 0x196   : > { %4489 = vmatprep.subr.bf16.mxu1 %v4707_v60  ;;  %4529 = vmatprep.mubr.bf16.mxu0 %v3992_v9  ;;  %v2508_v9 = vshll.u32 %v2452_v11, 16  ;;  %v4720_v11 = vld [vmem:[%s5981_s3 + $0x1f0] sm:$0xff]   ;;  %v2547_v1 = vshrl.u32 %v2458_v51, 16  ;;  %v2550_v53 = vshll.u32 %v2458_v51, 16  ;;  %v4723_v12 = vld [vmem:[%s5981_s3 + $0x1b8] sm:$0xff]  }
 0x197   : > { %4518 = vmatpush3.bf16.msra.mxu0 %v4706_v32  ;;  %v3972_v32 = vrot.slane %v2732_v20, 9  ;;  %v5719_v29 = vsel %vm5159_vm7, %v3970_v62, %v2762_v50  ;;  %v2493_v20 = vrot.slane %v2491_v34, 4  ;;  %v2778_v62 = vrot.slane %v5739_v41, 5  ;;  %v3113_v51 = vld [vmem:[#allocation2 + $0x20] sm:$0xf] }
 0x198   : > { %4458 = vmatmul.mubr.bf16.vlgmr.msra.gmra.mxu1 %v3901_v44  ;;  %4519 = vmatprep.subr.bf16.mxu0 %v4708_v38  ;;  %v2536_v44 = vshll.u32 %v2456_v45, 16  ;;  %v2510_v24 = vrot.slane %v2508_v9, 5  ;;  %v3993_v57 = vcombine.low %v5719_v29, %v5723_v16  ;;  %v2524_v50 = vrot.slane %v2522_v8, 5 }
 0x199   : > { %4461 = vmatprep.mubr.bf16.mxu1 %v3902_v21  ;;  %4490 = vmatpush3.bf16.msra.mxu1 %v4707_v60  ;;  %v4716_v60 = vld [vmem:[%s5981_s3 + $0x140] sm:$0xff]   ;;  %v4718_v21 = vld [vmem:[%s5981_s3 + $0x1f8] sm:$0xff]   ;;  %v3146_v48 = vor.u32 %v3145_v35, %v3142_v54  ;;  %v2542_v9 = vshll.u32 %v5702_v27, 16  ;;  %v2549_v34 = vrot.slane %v2547_v1, 4  ;;  %v4729_v1 = vld [vmem:[%s5981_s3 + $0x1d0] sm:$0xff]  }
 0x19a   : > { %4491 = vmatprep.subr.bf16.mxu1 %v4709_v46  ;;  %v2538_v25 = vrot.slane %v2536_v44, 5  ;;  %v2511_v37 = vor.u32 %v2510_v24, %v2507_v15  ;;  %v4724_v35 = vld [vmem:[%s5981_s3 + $0x1e0] sm:$0xff]  }
 0x19b   : > { %4520 = vmatpush3.bf16.msra.mxu0 %v4708_v38  ;;  %v2735_v38 = vld [vmem:[#allocation2 + $0x40] sm:$0xe]  ;;  %v3147_v44 = vrot.slane %v3146_v48, 4 }
 0x19c   : > { %4521 = vmatprep.subr.bf16.mxu0 %v4710_v31  ;;  %v3975_v6 = vrot.slane %v2735_v38, 9  ;;  %v2539_v45 = vor.u32 %v2538_v25, %v2535_v5  ;;  %v2512_v38 = vrot.slane %v2511_v37, 4 }
 0x19d   : > { %4492 = vmatpush3.bf16.msra.mxu1 %v4709_v46  ;;  %v2771_v46 = vsel %vm5159_vm7, %v3972_v32, %v2770_v7 }
 0x19e   : > { %4493 = vmatprep.subr.bf16.mxu1 %v4711_v42  ;;  %v3994_v13 = vcombine.low %v2771_v46, %v2775_v63  ;;  %v2540_v46 = vrot.slane %v2539_v45, 4 }
 0x19f   : > { %4522 = vmatpush3.bf16.msra.mxu0 %v4710_v31  ;;  %v3131_v31 = vrot.slane %v3129_v36, 5  ;;  %v4721_v36 = vld [vmem:[%s5981_s3 + $0x100] sm:$0xff]  }
 0x1a0   : > { %4462 = vmatmul.mubr.bf16.gmra.mxu1 %v3903_v19  ;;  %4523 = vmatprep.subr.bf16.mxu0 %v4712_v58  ;;  %v2496_v19 = vrot.slane %v2494_v18, 5  ;;  %v2552_v18 = vrot.slane %v2550_v53, 5 }
 0x1a1   : > { %4494 = vmatpush3.bf16.msra.mxu1 %v4711_v42  ;;  %4505 = vmatprep.mubr.bf16.mxu1 %v3956_v2  ;;  %v2782_v42 = vrot.slane %v5725_v43, 5  ;;  %v3132_v49 = vor.u32 %v3131_v31, %v3128_v61  ;;  %v2521_v2 = vrot.slane %v2519_v17, 4  ;;  %v2544_v31 = vrot.slane %v2542_v9, 5 }
 0x1a2   : > { %4495 = vmatprep.subr.bf16.mxu1 %v4713_v56  ;;  %v2502_v17 = vrot.slane %v2500_v40, 5 }
 0x1a3   : > { %4524 = vmatpush3.bf16.msra.mxu0 %v4712_v58  ;;  %v2460_v58 = vld [vmem:[#allocation2 + $0x40] sm:$0xf]  ;;  %v2783_v3 = vsel %vm5159_vm7, %v3975_v6, %v2782_v42  ;;  %v3133_v29 = vrot.slane %v3132_v49, 4  ;;  %v2525_v52 = vor.u32 %v2524_v50, %v2521_v2  ;;  %v2545_v54 = vsel %vm5034_vm4, %v2540_v46, %v2544_v31  ;;  %v3117_v50 = vld [vmem:[#allocation2 + $0x30] sm:$0xf] }
 0x1a4   : > { %4525 = vmatprep.subr.bf16.mxu0 %v4714_v23  ;;  %v2561_v32 = vshrl.u32 %v2460_v58, 16  ;;  %v2564_v7 = vshll.u32 %v2460_v58, 16  ;;  %v2553_v58 = vor.u32 %v2552_v18, %v2549_v34  ;;  %v2556_v49 = vshll.u32 %v5739_v41, 16  ;;  %v4727_v41 = vld [vmem:[%s5981_s3 + $0x1a8] sm:$0xff]  }
 0x1a5   : > { %4496 = vmatpush3.bf16.msra.mxu1 %v4713_v56  ;;  %v4719_v56 = vld [vmem:[%s5981_s3 + $0x108] sm:$0xff]   ;;  %v2526_v61 = vrot.slane %v2525_v52, 4  ;;  %v3185_v22 = vshll.u32 %v3117_v50, 16 }
 0x1a6   : > { %4497 = vmatprep.subr.bf16.mxu1 %v4715_v33  ;;  %v2566_v10 = vrot.slane %v2564_v7, 5  ;;  %v2558_v48 = vrot.slane %v2556_v49, 5 }
 0x1a7   : > { %4526 = vmatpush3.bf16.msra.mxu0 %v4714_v23  ;;  %v5751_v23 = vld [vmem:[#allocation2 + $0x1c] sm:$0x1] }
 0x1a8   : > { %4527 = vmatprep.subr.bf16.mxu0 %v4716_v60  ;;  %v3149_v16 = vshll.u32 %v5751_v23, 16 }
 0x1a9   : > { %4498 = vmatpush3.bf16.msra.mxu1 %v4715_v33  ;;  %v2497_v33 = vor.u32 %v2496_v19, %v2493_v20  ;;  %v4725_v19 = vld [vmem:[%s5981_s3 + $0x1b0] sm:$0xff]  }
 0x1aa   : > { %4499 = vmatprep.subr.bf16.mxu1 %v4717_v0  ;;  %v3151_v14 = vrot.slane %v3149_v16, 5 }
 0x1ab   : > { %4528 = vmatpush3.bf16.msra.mxu0 %v4716_v60  ;;  %v2514_v60 = vshll.u32 %v5691_v30, 16  ;;  %v2563_v30 = vrot.slane %v2561_v32, 4  ;;  %v2498_v63 = vrot.slane %v2497_v33, 4  ;;  %v3154_v33 = vshrl.u32 %v3113_v51, 16 }
 0x1ac   : > { %4561 = vmatprep.subr.bf16.mxu0 %v4718_v21  ;;  %v3152_v15 = vsel %vm5034_vm4, %v3147_v44, %v3151_v14  ;;  %v5816_v14 = vld [vmem:[#allocation2 + $0x34] sm:$0x1] }
 0x1ad   : > { %4500 = vmatpush3.bf16.msra.mxu1 %v4717_v0  ;;  %v2528_v0 = vshll.u32 %v5695_v4, 16  ;;  %v2516_v27 = vrot.slane %v2514_v60, 5  ;;  %v2779_v4 = vsel %vm5159_vm7, %v3974_v28, %v2778_v62  ;;  %v2567_v6 = vor.u32 %v2566_v10, %v2563_v30 }
 0x1ae   : > { %4530 = vmatmul.mubr.bf16.vlgmr.msra.gmra.mxu0 %v3993_v57  ;;  %4501 = vmatprep.subr.bf16.mxu1 %v4719_v56  ;;  %v3995_v42 = vcombine.low %v2779_v4, %v2783_v3  ;;  %v2503_v5 = vsel %vm5034_vm4, %v2498_v63, %v2502_v17  ;;  %v2570_v57 = vshll.u32 %v5725_v43, 16  ;;  %v4726_v43 = vld [vmem:[%s5981_s3 + $0x1d8] sm:$0xff]   ;;  %v3182_v3 = vshrl.u32 %v3117_v50, 16  ;;  %v4731_v63 = vld [vmem:[%s5981_s3 + $0x1c8] sm:$0xff]   ;;  %v5821_v17 = vld [vmem:[#allocation2 + $0x24] sm:$0x1] }
 0x1af   : > { %4533 = vmatprep.mubr.bf16.mxu0 %v3994_v13  ;;  %4562 = vmatpush3.bf16.msra.mxu0 %v4718_v21  ;;  %v3138_v21 = vsel %vm5034_vm4, %v3133_v29, %v3137_v47  ;;  %v2517_v8 = vsel %vm5034_vm4, %v2512_v38, %v2516_v27  ;;  %v2530_v24 = vrot.slane %v2528_v0, 5  ;;  %v2568_v2 = vrot.slane %v2567_v6, 4  ;;  %v3123_v29 = vld [vmem:[#allocation2 + $0x48] sm:$0xf]  ;;  %v4730_v38 = vld [vmem:[%s5981_s3 + $0x1a0] sm:$0xff]   ;;  %v4732_v4 = vld [vmem:[%s5981_s3 + $0x198] sm:$0xff]  }
 0x1b0   : > { %4563 = vmatprep.subr.bf16.mxu0 %v4720_v11  ;;  %v4048_v25 = vcombine.low %v3138_v21, %v3152_v15  ;;  %v3957_v28 = vcombine.low %v2503_v5, %v2517_v8  ;;  %v2554_v13 = vrot.slane %v2553_v58, 4  ;;  %v2572_v37 = vrot.slane %v2570_v57, 5  ;;  %v4728_v47 = vld [vmem:[#allocation2 + $0x10] ss:$8 sps:$4 sm:$0xff]   ;;  %v5814_v27 = vld [vmem:[#allocation2 + $0x2c] sm:$0x1] }
 0x1b1   : > { %4502 = vmatpush3.bf16.msra.mxu1 %v4719_v56  ;;  %v2531_v20 = vsel %vm5034_vm4, %v2526_v61, %v2530_v24  ;;  %v3115_v56 = vld [vmem:[#allocation2 + $0x28] sm:$0xf]  ;;  %v3157_v60 = vshll.u32 %v3113_v51, 16  ;;  %v3184_v30 = vrot.slane %v3182_v3, 4  ;;  %v3187_v10 = vrot.slane %v3185_v22, 5  ;;  %v4733_v24 = vld [vmem:[%s5981_s3 + $0x1c0] sm:$0xff]  }
 0x1b2   : > { %4503 = vmatprep.subr.bf16.mxu1 %v4721_v36  ;;  %v3958_v62 = vcombine.low %v2531_v20, %v2545_v54  ;;  %v3168_v32 = vshrl.u32 %v3115_v56, 16  ;;  %v3171_v7 = vshll.u32 %v3115_v56, 16  ;;  %v2573_v45 = vsel %vm5034_vm4, %v2568_v2, %v2572_v37  ;;  %v5824_v15 = vld [vmem:[#allocation2 + $0x3c] sm:$0x1]  ;;  %v5835_v51 = vld [vmem:[#allocation2 + $0x44] sm:$0x1] }
 0x1b3   : > { %4564 = vmatpush3.bf16.msra.mxu0 %v4720_v11  ;;  %v3119_v11 = vld [vmem:[#allocation2 + $0x38] sm:$0xf]  ;;  %v2559_v16 = vsel %vm5034_vm4, %v2554_v13, %v2558_v48  ;;  %v3156_v44 = vrot.slane %v3154_v33, 4  ;;  %v3159_v0 = vrot.slane %v3157_v60, 5  ;;  %v3224_v46 = vshrl.u32 %v3123_v29, 16  ;;  %v4735_v3 = vld [vmem:[%s5981_s3 + $0x188] sm:$0xff]  }
 0x1b4   : > { %4565 = vmatprep.subr.bf16.mxu0 %v4722_v26  ;;  %v3196_v53 = vshrl.u32 %v3119_v11, 16  ;;  %v3170_v52 = vrot.slane %v3168_v32, 4  ;;  %v3173_v9 = vrot.slane %v3171_v7, 5  ;;  %v3959_v40 = vcombine.low %v2559_v16, %v2573_v45  ;;  %v5837_v13 = vld [vmem:[#allocation2 + $0x4c] sm:$0x1] }
 0x1b5   : > { %4504 = vmatpush3.bf16.msra.mxu1 %v4721_v36  ;;  %v3199_v36 = vshll.u32 %v3119_v11, 16  ;;  %v3188_v8 = vor.u32 %v3187_v10, %v3184_v30  ;;  %v3160_v6 = vor.u32 %v3159_v0, %v3156_v44  ;;  %v3191_v54 = vshll.u32 %v5816_v14, 16  ;;  %v4738_v30 = vld [vmem:[%s5981_s3 + $0x238] sm:$0xff]   ;;  %v4740_v44 = vld [vmem:[%s5981_s3 + $0x230] sm:$0xff]  }
 0x1b6   : > { %4534 = vmatmul.mubr.bf16.gmra.mxu0 %v3995_v42  ;;  %4537 = vmatprep.subr.bf16.mxu1 %v4723_v12  ;;  %v3198_v34 = vrot.slane %v3196_v53, 4  ;;  %v3174_v21 = vor.u32 %v3173_v9, %v3170_v52  ;;  %v3177_v42 = vshll.u32 %v5814_v27, 16  ;;  %v3226_v5 = vrot.slane %v3224_v46, 4  ;;  %v4736_v52 = vld [vmem:[%s5981_s3 + $0x180] sm:$0xff]   ;;  %v4739_v0 = vld [vmem:[#allocation2 + $0x30] ss:$8 sps:$4 sm:$0xff]  }
 0x1b7   : > { %4566 = vmatpush3.bf16.msra.mxu0 %v4722_v26  ;;  %4577 = vmatprep.mubr.bf16.mxu0 %v4048_v25  ;;  %v3121_v26 = vld [vmem:[#allocation2 + $0x40] sm:$0xf]  ;;  %v3201_v18 = vrot.slane %v3199_v36, 5  ;;  %v3163_v58 = vshll.u32 %v5821_v17, 16  ;;  %v3189_v56 = vrot.slane %v3188_v8, 4  ;;  %v3161_v49 = vrot.slane %v3160_v6, 4 }
 0x1b8   : > { %4506 = vmatmul.mubr.bf16.vlgmr.msra.gmra.mxu1 %v3957_v28  ;;  %4567 = vmatprep.subr.bf16.mxu0 %v4724_v35  ;;  %v3210_v61 = vshrl.u32 %v3121_v26, 16  ;;  %v3213_v31 = vshll.u32 %v3121_v26, 16  ;;  %v3175_v57 = vrot.slane %v3174_v21, 4  ;;  %v3179_v2 = vrot.slane %v3177_v42, 5  ;;  %v3391_v26 = vld [vmem:[#allocation2 + $0x10] sm:$0xe] }
 0x1b9   : > { %4509 = vmatprep.mubr.bf16.mxu1 %v3958_v62  ;;  %4538 = vmatpush3.bf16.msra.mxu1 %v4723_v12  ;;  %v3227_v12 = vshll.u32 %v3123_v29, 16  ;;  %v3205_v62 = vshll.u32 %v5824_v15, 16  ;;  %v3193_v50 = vrot.slane %v3191_v54, 5  ;;  %v3165_v32 = vrot.slane %v3163_v58, 5  ;;  %v3392_v46 = vld [vmem:[#allocation2 + $0x18] sm:$0xe] }
 0x1ba   : > { %4539 = vmatprep.subr.bf16.mxu1 %v4725_v19  ;;  %v3212_v28 = vrot.slane %v3210_v61, 4  ;;  %v3215_v20 = vrot.slane %v3213_v31, 5  ;;  %v3180_v7 = vsel %vm5034_vm4, %v3175_v57, %v3179_v2  ;;  %v3219_v33 = vshll.u32 %v5835_v51, 16  ;;  %v4741_v61 = vld [vmem:[#allocation2 + $0x40] ss:$8 sps:$4 sm:$0xff]   ;;  %v4745_v8 = vld [vmem:[%s5981_s3 + $0x210] sm:$0xff]  }
 0x1bb   : > { %4568 = vmatpush3.bf16.msra.mxu0 %v4724_v35  ;;  %v3202_v35 = vor.u32 %v3201_v18, %v3198_v34  ;;  %v3229_v25 = vrot.slane %v3227_v12, 5  ;;  %v3194_v22 = vsel %vm5034_vm4, %v3189_v56, %v3193_v50  ;;  %v3207_v48 = vrot.slane %v3205_v62, 5  ;;  %v4742_v34 = vld [vmem:[%s5981_s3 + $0x228] sm:$0xff]   ;;  %v4747_v54 = vld [vmem:[%s5981_s3 + $0x200] sm:$0xff]   ;;  %v3396_v58 = vld [vmem:[#allocation2 + $0x38] sm:$0xe] }
 0x1bc   : > { %4569 = vmatprep.subr.bf16.mxu0 %v4726_v43  ;;  %v3216_v11 = vor.u32 %v3215_v20, %v3212_v28  ;;  %v3166_v45 = vsel %vm5034_vm4, %v3161_v49, %v3165_v32  ;;  %v3221_v9 = vrot.slane %v3219_v33, 5  ;;  %v4060_v39 = vrot.slane %v3391_v26, 9  ;;  %v4746_v6 = vld [vmem:[%s5981_s3 + $0x208] sm:$0xff]  }
 0x1bd   : > { %4540 = vmatpush3.bf16.msra.mxu1 %v4725_v19  ;;  %v4734_v19 = vld [vmem:[%s5981_s3 + $0x190] sm:$0xff]   ;;  %v3230_v37 = vor.u32 %v3229_v25, %v3226_v5  ;;  %v4049_v60 = vcombine.low %v3166_v45, %v3180_v7  ;;  %v4061_v18 = vrot.slane %v3392_v46, 9  ;;  %v3421_v12 = vrot.slane %v5751_v23, 5  ;;  %v4744_v23 = vld [vmem:[%s5981_s3 + $0x218] sm:$0xff]   ;;  %v3394_v42 = vld [vmem:[#allocation2 + $0x28] sm:$0xe] }
 0x1be   : > { %4541 = vmatprep.subr.bf16.mxu1 %v4727_v41  ;;  %v3217_v36 = vrot.slane %v3216_v11, 4  ;;  %v4063_v5 = vrot.slane %v3394_v42, 9  ;;  %v3429_v25 = vrot.slane %v5814_v27, 5  ;;  %v3433_v28 = vrot.slane %v5816_v14, 5  ;;  %v3398_v2 = vld [vmem:[#allocation2 + $0x48] sm:$0xe] }
 0x1bf   : > { %4570 = vmatpush3.bf16.msra.mxu0 %v4726_v43  ;;  %v3203_v43 = vrot.slane %v3202_v35, 4  ;;  %v3231_v29 = vrot.slane %v3230_v37, 4  ;;  %v3422_v31 = vsel %vm5159_vm7, %v4061_v18, %v3421_v12  ;;  %v3393_v35 = vld [vmem:[#allocation2 + $0x20] sm:$0xe]  ;;  %v4065_v56 = vrot.slane %v3396_v58, 9 }
 0x1c0   : > { %4510 = vmatmul.mubr.bf16.gmra.mxu1 %v3959_v40  ;;  %4571 = vmatprep.subr.bf16.mxu0 %v4729_v1  ;;  %v3222_v40 = vsel %vm5034_vm4, %v3217_v36, %v3221_v9  ;;  %v4062_v20 = vrot.slane %v3393_v35, 9  ;;  %v3437_v62 = vrot.slane %v5824_v15, 5  ;;  %v3430_v49 = vsel %vm5159_vm7, %v4063_v5, %v3429_v25  ;;  %v3397_v27 = vld [vmem:[#allocation2 + $0x40] sm:$0xe] }
 0x1c1   : > { %4542 = vmatpush3.bf16.msra.mxu1 %v4727_v41  ;;  %4553 = vmatprep.mubr.bf16.mxu1 %v4728_v47  ;;  %v3233_v41 = vshll.u32 %v5837_v13, 16  ;;  %v4737_v47 = vld [vmem:[#allocation2 + $0x20] ss:$8 sps:$4 sm:$0xff]   ;;  %v4067_v37 = vrot.slane %v3398_v2, 9  ;;  %v4066_v7 = vrot.slane %v3397_v27, 9  ;;  %v3441_v15 = vrot.slane %v5835_v51, 5 }
 0x1c2   : > { %4543 = vmatprep.subr.bf16.mxu1 %v4730_v38  ;;  %v3445_v11 = vrot.slane %v5837_v13, 5 }
 0x1c3   : > { %4572 = vmatpush3.bf16.msra.mxu0 %v4729_v1  ;;  %v3208_v1 = vsel %vm5034_vm4, %v3203_v43, %v3207_v48  ;;  %v3235_v16 = vrot.slane %v3233_v41, 5  ;;  %v3442_v41 = vsel %vm5159_vm7, %v4066_v7, %v3441_v15 }
 0x1c4   : > { %4573 = vmatprep.subr.bf16.mxu0 %v4731_v63  ;;  %v4050_v53 = vcombine.low %v3194_v22, %v3208_v1 }
 0x1c5   : > { %4544 = vmatpush3.bf16.msra.mxu1 %v4730_v38  ;;  %v3236_v38 = vsel %vm5034_vm4, %v3231_v29, %v3235_v16 }
 0x1c6   : > { %4545 = vmatprep.subr.bf16.mxu1 %v4732_v4  ;;  %v4051_v10 = vcombine.low %v3222_v40, %v3236_v38 }
 0x1c7   : > { %4574 = vmatpush3.bf16.msra.mxu0 %v4731_v63  ;;  %v3417_v63 = vrot.slane %v5745_v59, 5  ;;  %v4743_v59 = vld [vmem:[%s5981_s3 + $0x220] sm:$0xff]  }
 0x1c8   : > { %4575 = vmatprep.subr.bf16.mxu0 %v4733_v24 }
 0x1c9   : > { %4546 = vmatpush3.bf16.msra.mxu1 %v4732_v4  ;;  %v3418_v21 = vsel %vm5159_vm7, %v4060_v39, %v3417_v63 }
 0x1ca   : > { %4547 = vmatprep.subr.bf16.mxu1 %v4734_v19  ;;  %v4084_v4 = vcombine.low %v3418_v21, %v3422_v31 }
 0x1cb   : > { %4576 = vmatpush3.bf16.msra.mxu0 %v4733_v24  ;;  %v3395_v24 = vld [vmem:[#allocation2 + $0x30] sm:$0xe] }
 0x1cc   : > { %v4064_v57 = vrot.slane %v3395_v24, 9 }
 0x1cd   : > { %4548 = vmatpush3.bf16.msra.mxu1 %v4734_v19  ;;  %v3425_v19 = vrot.slane %v5821_v17, 5  ;;  %v3438_v17 = vsel %vm5159_vm7, %v4065_v56, %v3437_v62 }
 0x1ce   : > { %4578 = vmatmul.mubr.bf16.vlgmr.msra.gmra.mxu0 %v4049_v60  ;;  %4549 = vmatprep.subr.bf16.mxu1 %v4735_v3  ;;  %v3434_v50 = vsel %vm5159_vm7, %v4064_v57, %v3433_v28 }
 0x1cf   : > { %4581 = vmatprep.mubr.bf16.mxu0 %v4050_v53  ;;  %v3426_v14 = vsel %vm5159_vm7, %v4062_v20, %v3425_v19  ;;  %v4086_v32 = vcombine.low %v3434_v50, %v3438_v17 }
 0x1d0   : > { %v4085_v43 = vcombine.low %v3426_v14, %v3430_v49 }
 0x1d1   : > { %4550 = vmatpush3.bf16.msra.mxu1 %v4735_v3  ;;  %v3446_v3 = vsel %vm5159_vm7, %v4067_v37, %v3445_v11 }
 0x1d2   : > { %4551 = vmatprep.subr.bf16.mxu1 %v4736_v52  ;;  %v4087_v22 = vcombine.low %v3442_v41, %v3446_v3 }
 0x1d5   : > { %4552 = vmatpush3.bf16.msra.mxu1 %v4736_v52 }
 0x1d6   : > { %4582 = vmatmul.mubr.bf16.gmra.mxu0 %v4051_v10  ;;  %4585 = vmatprep.subr.bf16.mxu1 %v4738_v30 }
 0x1d8   : > { %4554 = vmatmul.mubr.bf16.vlgmr.msra.gmra.mxu1 %v4737_v47 }
 0x1d9   : > { %4557 = vmatprep.mubr.bf16.mxu1 %v4739_v0  ;;  %4586 = vmatpush3.bf16.msra.mxu1 %v4738_v30 }
 0x1da   : > { %4587 = vmatprep.subr.bf16.mxu1 %v4740_v44 }
 0x1dd   : > { %4588 = vmatpush3.bf16.msra.mxu1 %v4740_v44 }
 0x1de   : > { %4589 = vmatprep.subr.bf16.mxu1 %v4742_v34 }
 0x1e0   : > { %4558 = vmatmul.mubr.bf16.gmra.mxu1 %v4741_v61 }
 0x1e1   : > { %4590 = vmatpush3.bf16.msra.mxu1 %v4742_v34  ;;  %4601 = vmatprep.mubr.bf16.mxu1 %v4084_v4 }
 0x1e2   : > { %4591 = vmatprep.subr.bf16.mxu1 %v4743_v59 }
 0x1e5   : > { %4592 = vmatpush3.bf16.msra.mxu1 %v4743_v59 }
 0x1e6   : > { %4593 = vmatprep.subr.bf16.mxu1 %v4744_v23 }
 0x1e9   : > { %4594 = vmatpush3.bf16.msra.mxu1 %v4744_v23 }
 0x1ea   : > { %4595 = vmatprep.subr.bf16.mxu1 %v4745_v8 }
 0x1ed   : > { %4596 = vmatpush3.bf16.msra.mxu1 %v4745_v8 }
 0x1ee   : > { %4597 = vmatprep.subr.bf16.mxu1 %v4746_v6 }
 0x1f1   : > { %4598 = vmatpush3.bf16.msra.mxu1 %v4746_v6 }
 0x1f2   : > { %4599 = vmatprep.subr.bf16.mxu1 %v4747_v54 }
 0x1f5   : > { %4600 = vmatpush3.bf16.msra.mxu1 %v4747_v54 }
 0x1f8   : > { %4602 = vmatmul.mubr.bf16.vlgmr.msra.gmra.mxu1 %v4085_v43 }
 0x1f9   : > { %4605 = vmatprep.mubr.bf16.mxu1 %v4086_v32 }
 0x200   : > { %4606 = vmatmul.mubr.bf16.gmra.mxu1 %v4087_v22 }
 0x22b   : > { %v4435_v1 = vpop.f32.mrf.mxu0 }
 0x22d   : > { %v2035_v36 = vpop.f32.mrf.mxu0 }
 0x22f   : > { %v4436_v29 = vpop.f32.mrf.mxu0 }
 0x231   : > { %v2038_v16 = vpop.f32.mrf.mxu0 }
 0x238   : > { %v4411_v48 = vpop.f32.mrf.mxu1  ;;  %v4439_v9 = vpop.f32.mrf.mxu0 }
 0x239   : > { %v2044_v2 = vadd.f32 %v4435_v1, %v4411_v48 }
 0x23a   : > { %v1898_v45 = vpop.f32.mrf.mxu1  ;;  %v2051_v55 = vpop.f32.mrf.mxu0 }
 0x23b   : > { %v2036_v14 = vadd.f32 %v2035_v36, %v1898_v45 }
 0x23c   : > { %v4412_v33 = vpop.f32.mrf.mxu1  ;;  %v4440_v30 = vpop.f32.mrf.mxu0 }
 0x23d   : > { %v2047_v37 = vadd.f32 %v4436_v29, %v4412_v33 }
 0x23e   : > { %v1901_v60 = vpop.f32.mrf.mxu1  ;;  %v2054_v26 = vpop.f32.mrf.mxu0 }
 0x23f   : > { %v2039_v15 = vadd.f32 %v2038_v16, %v1901_v60 }
 0x240   : > { %v4415_v53 = vpop.f32.mrf.mxu1 }
 0x241   : > { %v2060_v22 = vadd.f32 %v4439_v9, %v4415_v53 }
 0x242   : > { %v1914_v51 = vpop.f32.mrf.mxu1 }
 0x244   : > { %v5907_v13 = vpop.f32.mrf.mxu1 }
 0x245   : > { %6019 = vst [vmem:[#allocation11_spill] sm:$0xff] %v5907_v13 }
 0x246   : > { %v5909_v52 = vpop.f32.mrf.mxu1 }
 0x247   : > { %6020 = vst [vmem:[#allocation12_spill] sm:$0xff] %v5909_v52 }
 0x24c   : > { %v6024_v45 = vld [vmem:[#allocation11_spill] sm:$0xff] }
 0x24d   : > { %v4483_v44 = vpop.f32.mrf.mxu0 }
 0x24e   : > { %v6025_v60 = vld [vmem:[#allocation12_spill] sm:$0xff] }
 0x24f   : > { %v2407_v46 = vpop.f32.mrf.mxu0  ;;  %v2055_v16 = vadd.f32 %v2054_v26, %v6025_v60 }
 0x251   : > { %v4484_v63 = vpop.f32.mrf.mxu0 }
 0x253   : > { %v2410_v18 = vpop.f32.mrf.mxu0 }
 0x255   : > { %v4487_v21 = vpop.f32.mrf.mxu0 }
 0x257   : > { %v2423_v31 = vpop.f32.mrf.mxu0 }
 0x258   : > { %v4459_v40 = vpop.f32.mrf.mxu1 }
 0x259   : > { %v4488_v4 = vpop.f32.mrf.mxu0  ;;  %v2270_v43 = vadd.f32 %v4459_v40, %v2044_v2  ;;  %v2063_v2 = vadd.f32 %v4440_v30, %v6024_v45 }
 0x25a   : > { %v2237_v38 = vpop.f32.mrf.mxu1 }
 0x25b   : > { %v5911_v8 = vpop.f32.mrf.mxu0  ;;  %v2268_v32 = vadd.f32 %v2237_v38, %v2036_v14  ;;  %v2440_v41 = vadd.f32 %v4483_v44, %v2270_v43 }
 0x25c   : > { %v4460_v10 = vpop.f32.mrf.mxu1  ;;  %6021 = vst [vmem:[#allocation8_spill] sm:$0xff] %v5911_v8 }
 0x25d   : > { %v2271_v11 = vadd.f32 %v4460_v10, %v2047_v37  ;;  %v2438_v13 = vadd.f32 %v2407_v46, %v2268_v32 }
 0x25e   : > { %v2240_v47 = vpop.f32.mrf.mxu1 }
 0x25f   : > { %v2269_v8 = vadd.f32 %v2240_v47, %v2039_v15  ;;  %v2441_v36 = vadd.f32 %v4484_v63, %v2271_v11 }
 0x260   : > { %v4463_v0 = vpop.f32.mrf.mxu1 }
 0x261   : > { %v2274_v48 = vadd.f32 %v4463_v0, %v2060_v22  ;;  %v2439_v38 = vadd.f32 %v2410_v18, %v2269_v8 }
 0x262   : > { %v2253_v39 = vpop.f32.mrf.mxu1 }
 0x263   : > { %v2444_v9 = vadd.f32 %v4487_v21, %v2274_v48  ;;  %v6026_v26 = vld [vmem:[#allocation8_spill] sm:$0xff] }
 0x264   : > { %v4464_v34 = vpop.f32.mrf.mxu1 }
 0x265   : > { %v2275_v10 = vadd.f32 %v4464_v34, %v2063_v2 }
 0x266   : > { %v2256_v12 = vpop.f32.mrf.mxu1 }
 0x26e   : > { %v4531_v42 = vpop.f32.mrf.mxu0 }
 0x270   : > { %v2899_v54 = vpop.f32.mrf.mxu0 }
 0x272   : > { %v4532_v5 = vpop.f32.mrf.mxu0 }
 0x274   : > { %v2902_v58 = vpop.f32.mrf.mxu0 }
 0x276   : > { %v4535_v28 = vpop.f32.mrf.mxu0 }
 0x278   : > { %v4507_v61 = vpop.f32.mrf.mxu1  ;;  %v2915_v19 = vpop.f32.mrf.mxu0 }
 0x279   : > { %v2722_v52 = vadd.f32 %v4507_v61, %v2440_v41 }
 0x27a   : > { %v2689_v59 = vpop.f32.mrf.mxu1  ;;  %v5913_v62 = vpop.f32.mrf.mxu0 }
 0x27b   : > { %6022 = vst [vmem:[#allocation6_spill] sm:$0xff] %v5913_v62  ;;  %v2052_v62 = vadd.f32 %v2051_v55, %v1914_v51  ;;  %v2932_v14 = vadd.f32 %v4531_v42, %v2722_v52  ;;  %v2273_v51 = vadd.f32 %v2256_v12, %v2055_v16 }
 0x27c   : > { %v4508_v23 = vpop.f32.mrf.mxu1  ;;  %v5915_v50 = vpop.f32.mrf.mxu0 }
 0x27d   : > { %6023 = vst [vmem:[#allocation9_spill] sm:$0xff] %v5915_v50  ;;  %v2720_v50 = vadd.f32 %v2689_v59, %v2438_v13  ;;  %v2272_v40 = vadd.f32 %v2253_v39, %v2052_v62  ;;  %v2723_v33 = vadd.f32 %v4508_v23, %v2441_v36  ;;  %v2445_v39 = vadd.f32 %v4488_v4, %v2275_v10  ;;  %v4096_v4 = vld [vmem:[%s5982_s4] ss:$0 sm:$0xff] }
 0x27e   : > { %v2692_v6 = vpop.f32.mrf.mxu1  ;;  %v2443_v34 = vadd.f32 %v6026_v26, %v2273_v51 }
 0x27f   : > { %v2721_v53 = vadd.f32 %v2692_v6, %v2439_v38  ;;  %v2930_v46 = vadd.f32 %v2899_v54, %v2720_v50  ;;  %v2442_v55 = vadd.f32 %v2423_v31, %v2272_v40  ;;  %v2933_v61 = vadd.f32 %v4532_v5, %v2723_v33 }
 0x280   : > { %v4511_v24 = vpop.f32.mrf.mxu1 }
 0x281   : > { %v2726_v13 = vadd.f32 %v4511_v24, %v2444_v9  ;;  %v2931_v18 = vadd.f32 %v2902_v58, %v2721_v53 }
 0x282   : > { %v2705_v35 = vpop.f32.mrf.mxu1 }
 0x283   : > { %v2724_v30 = vadd.f32 %v2705_v35, %v2442_v55  ;;  %v2936_v54 = vadd.f32 %v4535_v28, %v2726_v13 }
 0x284   : > { %v4512_v25 = vpop.f32.mrf.mxu1 }
 0x285   : > { %v2727_v8 = vadd.f32 %v4512_v25, %v2445_v39  ;;  %v2934_v24 = vadd.f32 %v2915_v19, %v2724_v30  ;;  %v6028_v19 = vld [vmem:[#allocation9_spill] sm:$0xff] }
 0x286   : > { %v2708_v57 = vpop.f32.mrf.mxu1 }
 0x28e   : > { %v4579_v17 = vpop.f32.mrf.mxu0 }
 0x290   : > { %v3352_v3 = vpop.f32.mrf.mxu0 }
 0x292   : > { %v4580_v29 = vpop.f32.mrf.mxu0 }
 0x294   : > { %v3355_v0 = vpop.f32.mrf.mxu0 }
 0x296   : > { %v4583_v42 = vpop.f32.mrf.mxu0 }
 0x298   : > { %v4555_v20 = vpop.f32.mrf.mxu1 }
 0x299   : > { %v3103_v47 = vadd.f32 %v4555_v20, %v2932_v14  ;;  %v2725_v20 = vadd.f32 %v2708_v57, %v2443_v34 }
 0x29a   : > { %v3070_v56 = vpop.f32.mrf.mxu1 }
 0x29b   : > { %v3101_v63 = vadd.f32 %v3070_v56, %v2930_v46  ;;  %v3385_v52 = vadd.f32 %v4579_v17, %v3103_v47  ;;  %v3368_v56 = vpop.f32.mrf.mxu0  ;;  %v2935_v37 = vadd.f32 %v6028_v19, %v2725_v20 }
 0x29c   : > { %v4556_v49 = vpop.f32.mrf.mxu1 }
 0x29d   : > { %v3104_v23 = vadd.f32 %v4556_v49, %v2933_v61  ;;  %v3383_v31 = vadd.f32 %v3352_v3, %v3101_v63  ;;  %v6027_v49 = vld [vmem:[#allocation6_spill] sm:$0xff]  ;;  %v4584_v3 = vpop.f32.mrf.mxu0 }
 0x29e   : > { %v3073_v27 = vpop.f32.mrf.mxu1  ;;  %v2937_v50 = vadd.f32 %v6027_v49, %v2727_v8 }
 0x29f   : > { %v3102_v6 = vadd.f32 %v3073_v27, %v2931_v18  ;;  %v3386_v25 = vadd.f32 %v4580_v29, %v3104_v23  ;;  %v3371_v10 = vpop.f32.mrf.mxu0 }
 0x2a0   : > { %v4559_v7 = vpop.f32.mrf.mxu1 }
 0x2a1   : > { %v3107_v5 = vadd.f32 %v4559_v7, %v2936_v54  ;;  %v3384_v17 = vadd.f32 %v3355_v0, %v3102_v6 }
 0x2a2   : > { %v3086_v1 = vpop.f32.mrf.mxu1 }
 0x2a3   : > { %v3105_v62 = vadd.f32 %v3086_v1, %v2934_v24  ;;  %v3389_v41 = vadd.f32 %v4583_v42, %v3107_v5 }
 0x2a4   : > { %v4560_v44 = vpop.f32.mrf.mxu1 }
 0x2a5   : > { %v3108_v57 = vadd.f32 %v4560_v44, %v2937_v50  ;;  %v3387_v48 = vadd.f32 %v3368_v56, %v3105_v62 }
 0x2a6   : > { %v3089_v59 = vpop.f32.mrf.mxu1 }
 0x2a7   : > { %v3106_v22 = vadd.f32 %v3089_v59, %v2935_v37  ;;  %v3390_v33 = vadd.f32 %v4584_v3, %v3108_v57 }
 0x2a9   : > { %v3388_v46 = vadd.f32 %v3371_v10, %v3106_v22 }
 0x2b8   : > { %v4603_v21 = vpop.f32.mrf.mxu1 }
 0x2b9   : > { %v3595_v12 = vadd.f32 %v4603_v21, %v3385_v52 }
 0x2ba   : > { %v3562_v35 = vpop.f32.mrf.mxu1 }
 0x2bb   : > { %v3593_v58 = vadd.f32 %v3562_v35, %v3383_v31  ;;  %v3610_v28 = vadd.f32 %v4096_v4, %v3595_v12 }
 0x2bc   : > { %v4604_v27 = vpop.f32.mrf.mxu1 }
 0x2bd   : > { %v3596_v43 = vadd.f32 %v4604_v27, %v3386_v25  ;;  %v3608_v15 = vadd.f32 %v4096_v4, %v3593_v58  ;;  %v3618_v36 = vmax.f32 %v3610_v28, 0.0 }
 0x2be   : > { %v3565_v32 = vpop.f32.mrf.mxu1 }
 0x2bf   : > { %v3611_v11 = vadd.f32 %v4096_v4, %v3596_v43  ;;  %v3594_v7 = vadd.f32 %v3565_v32, %v3384_v17  ;;  %v3616_v38 = vmax.f32 %v3608_v15, 0.0 }
 0x2c0   : > { %v4607_v1 = vpop.f32.mrf.mxu1 }
 0x2c1   : > { %v3619_v45 = vmax.f32 %v3611_v11, 0.0  ;;  %v3609_v2 = vadd.f32 %v4096_v4, %v3594_v7  ;;  %v3599_v40 = vadd.f32 %v4607_v1, %v3389_v41 }
 0x2c2   : > { %v3578_v29 = vpop.f32.mrf.mxu1 }
 0x2c3   : > { %v4135_v14 = vpack.c.bf16 %v3619_v45, %v3618_v36  ;;  %v3617_v60 = vmax.f32 %v3609_v2, 0.0  ;;  %v3597_v16 = vadd.f32 %v3578_v29, %v3387_v48  ;;  %v3614_v9 = vadd.f32 %v4096_v4, %v3599_v40 }
 0x2c4   : > { %v4608_v44 = vpop.f32.mrf.mxu1 }
 0x2c5   : > { %4147 = vst [vmem:[%s217_s23 + $0x8] sm:$0xff] %v4135_v14   ;;  %v4130_v53 = vpack.c.bf16 %v3617_v60, %v3616_v38  ;;  %v3600_v47 = vadd.f32 %v4608_v44, %v3390_v33  ;;  %v3612_v55 = vadd.f32 %v4096_v4, %v3597_v16  ;;  %v3622_v63 = vmax.f32 %v3614_v9, 0.0 }
 0x2c6   : > { %v3581_v51 = vpop.f32.mrf.mxu1 }
 0x2c7   : > { %4131 = vst [vmem:[%s217_s23] sm:$0xff] %v4130_v53   ;;  %v3615_v0 = vadd.f32 %v4096_v4, %v3600_v47  ;;  %v3598_v13 = vadd.f32 %v3581_v51, %v3388_v46  ;;  %v3620_v39 = vmax.f32 %v3612_v55, 0.0 }
 0x2c9   : > { %v3623_v61 = vmax.f32 %v3615_v0, 0.0  ;;  %v3613_v30 = vadd.f32 %v4096_v4, %v3598_v13 }
 0x2cb   : > { %v4145_v59 = vpack.c.bf16 %v3623_v61, %v3622_v63  ;;  %v3621_v23 = vmax.f32 %v3613_v30, 0.0 }
 0x2cd   : > { %4149 = vst [vmem:[%s217_s23 + $0x18] sm:$0xff] %v4145_v59   ;;  %v4140_v18 = vpack.c.bf16 %v3621_v23, %v3620_v39 }
 0x2cf   : > { %4148 = vst [vmem:[%s217_s23 + $0x10] sm:$0xff] %v4140_v18  }
 0x2d0   : > { %4761 = shalt.err (!%p4758_p3)
}
 0x2d1   : > { %s4762_s12 = scalar_lea.hbm %s5932_s7, 512  ;;  %s4766_s15 = scalar_lea.hbm %s5983_s5, 1024 }
 0x2d2   : > { %p4763_p4 = scmp.ne.s32.totalorder %s5932_s7, %s4762_s12  ;;  %p4767_p9 = scmp.lt.s32.totalorder %s5932_s7, %s5983_s5 }
 0x2d3   : > { %p4768_p10 = scmp.lt.s32.totalorder %s4766_s15, %s4762_s12 }
 0x2d4   : > { %p4764_p7 = pnand %p4763_p4, %p4882_p5 }
 0x2d5   : > { %p4769_p11 = por %p4768_p10, %p4767_p9 }
 0x2d6   : > { %p4765_p8 = pneg %p4764_p7 }
 0x2d8   : > { %p4770_p12 = pnand %p4769_p11, %p4765_p8 }
 0x2da   : > { %4773 = shalt.err (!%p4770_p12)
}
 0x2db   : > { %s4812_s23 = smov 64   ;;  %s4813_s26 = smov 4  }
 0x2dc   : > { %4622 = dma.vmem_to_hbm [thread:$0]  (%p4882_p5), %s5934_s25, 512, %s5932_s7, %s5938_s8, %s4812_s23, %s4812_s23, %s4813_s26  }
 0x2dd PF: > { %p4628_p13 = scmp.ge.s32.totalorder %s4808_s21, 2  ;;  %s3693_s30 = sand.u32 1, %s4796_s18  }
 0x2de   : > { %s3694_s6 = scalar_lea.sflag [#allocation4], %s3693_s30 }
 0x2df   : > { %p4625_p0 = pnand %p4628_p13, %p4886_p6 }
 0x2e1   : > { %p4626_p1 = pneg %p4625_p0 }
 0x2e3   : > { %4791 = dma.done.wait (%p4626_p1), %s3694_s6, 512  }
 0x2e4   : > { %4793 = vsyncadd (%p4626_p1), %s3694_s6, 4294966784  ;;  %p15_p2 = scmp.ge.s32.totalorder %s4869_s24, 4   ;;  %s6029_s18 = smov %s4800_s19 }
 0x2e5   : > { %s6030_s19 = smov %s4804_s20  ;;  %s6031_s20 = smov %s4880_s27 }
 0x2e6   : > { %s6032_s21 = smov %s4869_s24  ;;  %17 = sbr.rel (!%p15_p2) target bundleno = 3 (0x3), region = 94 }
 0x2eb   :  { %3699 = vsyncpa [#allocation4], 1 }
 0x2ec   :  { %3701 = vsyncpa [#allocation4 + $0x1], 1 }

</bundles_post_ra>
